<compile_context>
chip_gen: v6e
topology: v6e:2x2x1
jax: 0.10.0
libtpu: 0.0.40
codegen_flags: <defaults>
</compile_context>

<pallas_src>
import functools

import jax
import jax.numpy as jnp
import numpy as np
from jax import lax
from jax.experimental import pallas as pl
from jax.experimental.pallas import tpu as pltpu

BP = 8     # sublane-padded in-kernel batch (f32 sublane minimum)
WP = 128   # lane-padded head width (fusion/output padding)


def _round8(n):
    return (n + 7) // 8 * 8


def _lstm_blob_layout(n_flows, n_flow_layers, hidden, input_size):
    """Row offsets of the packed LSTM blob (width = 4 * n_flows * hidden)."""
    nH = n_flows * hidden
    meta = []
    rows = 0
    in_sz = _round8(n_flows * input_size)
    for _ in range(n_flow_layers):
        wih_off = rows
        rows += in_sz
        whh_off = rows
        rows += _round8(nH)
        b_off = rows
        rows += 8
        meta.append((wih_off, in_sz, whh_off, b_off))
        in_sz = _round8(nH)
    return tuple(meta), rows


def _head_blob_layout(nH):
    """Row offsets of the packed fusion/output blob (width = WP)."""
    rows = 0
    wf1_off = rows; rows += _round8(nH)
    bf1_off = rows; rows += 8
    wf2_off = rows; rows += WP
    bf2_off = rows; rows += 8
    wout_off = rows; rows += WP
    bout_off = rows; rows += 8
    return (wf1_off, bf1_off, wf2_off, bf2_off, wout_off, bout_off), rows


# ----------------------------------------------------------------------------
# Fully fused forward kernel
# ----------------------------------------------------------------------------
def _fused_kernel(x_ref, lstm_ref, head_ref, out_ref, *, T, nH, layer_meta,
                  head_meta):
    f32 = jnp.float32
    n_layers = len(layer_meta)

    def cell(g, c):
        # One sigmoid pass over the full gate vector; tanh only on the
        # cell-candidate block.  No full-width select.
        sig = jax.nn.sigmoid(g)
        i_g = sig[:, 0 * nH:1 * nH]
        f_g = sig[:, 1 * nH:2 * nH]
        o_g = sig[:, 3 * nH:4 * nH]
        g_g = jnp.tanh(g[:, 2 * nH:3 * nH])
        c_new = f_g * c + i_g * g_g
        h_new = o_g * jnp.tanh(c_new)
        return h_new, c_new

    # Hoist all weight loads out of the recurrence (static 8-row-aligned slices
    # of the packed blob).
    wih, whh, b = [], [], []
    for (wih_off, in_rows, whh_off, b_off) in layer_meta:
        wih.append(lstm_ref[wih_off:wih_off + in_rows, :])
        whh.append(lstm_ref[whh_off:whh_off + nH, :])
        b.append(lstm_ref[b_off:b_off + 1, :])

    # Layer-0 input-side gate matmul hoisted over all timesteps:
    # one (T*BP, in0) @ (in0, 4*nH) MXU pass, bias folded in.  Kept as a
    # traced value -- no scratch round-trip.
    gx0 = jnp.dot(x_ref[...], wih[0], preferred_element_type=f32) + b[0]

    h = [jnp.zeros((BP, nH), f32) for _ in range(n_layers)]
    c = [jnp.zeros((BP, nH), f32) for _ in range(n_layers)]

    # Fully unrolled time loop with the stacked layers interleaved per step:
    # layer l at step t depends only on layer l-1 at step t, so the serial
    # critical path is T + n_layers - 1 cell evaluations (not T * n_layers).
    for t in range(T):
        g = gx0[t * BP:(t + 1) * BP, :] + jnp.dot(
            h[0], whh[0], preferred_element_type=f32)
        h[0], c[0] = cell(g, c[0])
        for l in range(1, n_layers):
            g = (jnp.dot(h[l - 1], wih[l], preferred_element_type=f32) + b[l]
                 + jnp.dot(h[l], whh[l], preferred_element_type=f32))
            h[l], c[l] = cell(g, c[l])

    h_last = h[-1]  # (BP, nH); columns already [flow0 hidden | flow1 hidden]

    # ----- fusion MLP (tanh) + output layer + softmax (128-lane padded) -----
    (wf1_off, bf1_off, wf2_off, bf2_off, wout_off, bout_off) = head_meta
    wf1 = head_ref[wf1_off:wf1_off + nH, :]
    bf1 = head_ref[bf1_off:bf1_off + 1, :]
    wf2 = head_ref[wf2_off:wf2_off + WP, :]
    bf2 = head_ref[bf2_off:bf2_off + 1, :]
    wout = head_ref[wout_off:wout_off + WP, :]
    bout = head_ref[bout_off:bout_off + 1, :]

    f1 = jnp.tanh(jnp.dot(h_last, wf1, preferred_element_type=f32) + bf1)
    f2 = jnp.tanh(jnp.dot(f1, wf2, preferred_element_type=f32) + bf2)
    logits = (jnp.dot(f2, wout, preferred_element_type=f32)
              + bout)  # padded lanes carry -1e30 bias -> softmax exactly 0
    m = jnp.max(logits, axis=-1, keepdims=True)
    e = jnp.exp(logits - m)
    s = jnp.sum(e, axis=-1, keepdims=True)
    out_ref[...] = e / s  # exact reciprocal (off the hot path)


# ----------------------------------------------------------------------------
# One-time parameter packing (all layout plumbing OUTSIDE the forward)
# ----------------------------------------------------------------------------
def prepare_fused_params(params, *, n_flows, n_flow_layers, hidden, input_size,
                         fusion_neurons, output_neurons):
    H = hidden
    nH = n_flows * H
    G = 4 * nH

    def combine_w(mats_T):
        # mats_T[f]: (in_f, 4H) transposed per-flow weight, gate cols [i f g o]
        total_in = sum(m.shape[0] for m in mats_T)
        W = np.zeros((total_in, G), np.float32)
        r = 0
        for f, m in enumerate(mats_T):
            in_f = m.shape[0]
            for g in range(4):
                c0 = (g * n_flows + f) * H
                W[r:r + in_f, c0:c0 + H] = m[:, g * H:(g + 1) * H]
            r += in_f
        return W

    def combine_b(bs):
        out = np.zeros((1, G), np.float32)
        for f, bvec in enumerate(bs):
            for g in range(4):
                c0 = (g * n_flows + f) * H
                out[0, c0:c0 + H] = bvec[g * H:(g + 1) * H]
        return out

    layer_meta, lstm_rows = _lstm_blob_layout(n_flows, n_flow_layers, H,
                                              input_size)
    lstm_blob = np.zeros((lstm_rows, G), np.float32)
    for l, (wih_off, _, whh_off, b_off) in enumerate(layer_meta):
        wih_T = [np.asarray(params["flows"][f][l]["w_ih"]).T
                 for f in range(n_flows)]
        whh_T = [np.asarray(params["flows"][f][l]["w_hh"]).T
                 for f in range(n_flows)]
        bsum = [np.asarray(params["flows"][f][l]["b_ih"])
                + np.asarray(params["flows"][f][l]["b_hh"])
                for f in range(n_flows)]
        W_ih = combine_w(wih_T)
        lstm_blob[wih_off:wih_off + W_ih.shape[0], :] = W_ih
        lstm_blob[whh_off:whh_off + nH, :] = combine_w(whh_T)
        lstm_blob[b_off:b_off + 1, :] = combine_b(bsum)

    F1, F2 = fusion_neurons
    O = output_neurons
    assert F1 <= WP and F2 <= WP and O <= WP and nH <= WP
    (wf1_off, bf1_off, wf2_off, bf2_off, wout_off, bout_off), head_rows = \
        _head_blob_layout(nH)
    head_blob = np.zeros((head_rows, WP), np.float32)
    head_blob[wf1_off:wf1_off + nH, :F1] = np.asarray(params["fusion0_w"]).T
    head_blob[bf1_off, :F1] = np.asarray(params["fusion0_b"])
    head_blob[wf2_off:wf2_off + F1, :F2] = np.asarray(params["fusion1_w"]).T
    head_blob[bf2_off, :F2] = np.asarray(params["fusion1_b"])
    head_blob[wout_off:wout_off + F2, :O] = np.asarray(params["out_w"]).T
    head_blob[bout_off, :] = -1e30      # padded logits -> exp underflows to 0
    head_blob[bout_off, :O] = np.asarray(params["out_b"])

    return jnp.asarray(lstm_blob), jnp.asarray(head_blob)


# ----------------------------------------------------------------------------
# Forward pass: single fused pallas_call
# ----------------------------------------------------------------------------
@functools.partial(jax.jit, static_argnames=("n_flows", "n_flow_layers",
                                             "hidden", "fusion_neurons",
                                             "output_neurons"))
def n_flow_seq2one_forward(x, lstm_blob, head_blob, *, n_flows, n_flow_layers,
                           hidden, fusion_neurons, output_neurons):
    # x: (B, n_flows, T, D)
    B, nF, T, D = x.shape
    nH = n_flows * hidden
    in0 = _round8(nF * D)

    layer_meta, _ = _lstm_blob_layout(n_flows, n_flow_layers, hidden, D)
    head_meta, _ = _head_blob_layout(nH)

    # XLA-side layout plumbing: time-major, flows concatenated on the feature
    # axis, batch zero-padded to BP=8 sublanes so every per-timestep slice in
    # the kernel is an (8, .)-aligned tile.
    x_tm = jnp.transpose(x, (2, 0, 1, 3)).reshape(T, B, nF * D)
    x_cat = jnp.zeros((T, BP, in0), jnp.float32)
    x_cat = x_cat.at[:, :B, :nF * D].set(x_tm.astype(jnp.float32))
    x_cat = x_cat.reshape(T * BP, in0)

    kernel = functools.partial(_fused_kernel, T=T, nH=nH,
                               layer_meta=layer_meta, head_meta=head_meta)
    probs_pad = pl.pallas_call(
        kernel,
        out_shape=jax.ShapeDtypeStruct((BP, WP), jnp.float32),
        in_specs=[pl.BlockSpec(memory_space=pltpu.MemorySpace.VMEM)] * 3,
        out_specs=pl.BlockSpec(memory_space=pltpu.MemorySpace.VMEM),
    )(x_cat, lstm_blob, head_blob)
    # TODO(synk): for large real batches, chunk on a leading "parallel" grid
    # axis (uses the second TensorCore on v7x); at B=2 a grid is pure overhead.
    return probs_pad[:B, :output_neurons]


# ----------------------------------------------------------------------------
# Deterministic parameter init (PyTorch-shaped per-flow params)
# ----------------------------------------------------------------------------
def init_params(key, *, n_flows, n_flow_layers, input_size, hidden,
                fusion_neurons, output_neurons):
    def uni(k, shape, scale):
        return jax.random.uniform(k, shape, jnp.float32, -scale, scale)

    params = {"flows": []}
    kH = 1.0 / np.sqrt(hidden)
    keys = jax.random.split(key, n_flows * n_flow_layers * 4 + 6)
    ki = 0
    for _ in range(n_flows):
        layers = []
        in_sz = input_size
        for _ in range(n_flow_layers):
            layers.append({
                "w_ih": uni(keys[ki + 0], (4 * hidden, in_sz), kH),
                "w_hh": uni(keys[ki + 1], (4 * hidden, hidden), kH),
                "b_ih": uni(keys[ki + 2], (4 * hidden,), kH),
                "b_hh": uni(keys[ki + 3], (4 * hidden,), kH),
            })
            ki += 4
            in_sz = hidden
        params["flows"].append(layers)

    f_in = n_flows * hidden
    k1 = 1.0 / np.sqrt(f_in)
    params["fusion0_w"] = uni(keys[ki + 0], (fusion_neurons[0], f_in), k1)
    params["fusion0_b"] = uni(keys[ki + 1], (fusion_neurons[0],), k1)
    k2 = 1.0 / np.sqrt(fusion_neurons[0])
    params["fusion1_w"] = uni(keys[ki + 2],
                              (fusion_neurons[1], fusion_neurons[0]), k2)
    params["fusion1_b"] = uni(keys[ki + 3], (fusion_neurons[1],), k2)
    k3 = 1.0 / np.sqrt(fusion_neurons[1])
    params["out_w"] = uni(keys[ki + 4], (output_neurons, fusion_neurons[1]), k3)
    params["out_b"] = uni(keys[ki + 5], (output_neurons,), k3)
    return params


# ----------------------------------------------------------------------------
# Pure-JAX reference (same math) for a sanity check
# ----------------------------------------------------------------------------
def _lstm_ref(seq, p):
    B, T, _ = seq.shape
    H = p["w_hh"].shape[1]
    b = p["b_ih"] + p["b_hh"]

    def step(carry, x_t):
        h, c = carry
        gates = x_t @ p["w_ih"].T + h @ p["w_hh"].T + b
        i_g = jax.nn.sigmoid(gates[:, 0 * H:1 * H])
        f_g = jax.nn.sigmoid(gates[:, 1 * H:2 * H])
        g_g = jnp.tanh(gates[:, 2 * H:3 * H])
        o_g = jax.nn.sigmoid(gates[:, 3 * H:4 * H])
        c = f_g * c + i_g * g_g
        h = o_g * jnp.tanh(c)
        return (h, c), h

    init = (jnp.zeros((B, H), jnp.float32), jnp.zeros((B, H), jnp.float32))
    _, hs = lax.scan(step, init, jnp.transpose(seq, (1, 0, 2)))
    return jnp.transpose(hs, (1, 0, 2))  # (B, T, H)


def forward_ref(x, params, *, n_flows, n_flow_layers):
    outs = []
    for i in range(n_flows):
        seq = x[:, i]
        for l in range(n_flow_layers):
            seq = _lstm_ref(seq, params["flows"][i][l])
        outs.append(seq[:, -1, :])
    fused = jnp.concatenate(outs, axis=-1)
    h = jnp.tanh(fused @ params["fusion0_w"].T + params["fusion0_b"])
    h = jnp.tanh(h @ params["fusion1_w"].T + params["fusion1_b"])
    logits = h @ params["out_w"].T + params["out_b"]
    return jax.nn.softmax(logits, axis=-1)


if __name__ == "__main__":
    B, N_FLOWS, T, D = 2, 2, 8, 16
    HIDDEN, N_FLOW_LAYERS = 32, 2
    FUSION = (64, 32)
    OUT = 7

    key = jax.random.PRNGKey(0)
    kx, kp = jax.random.split(key)
    x = jax.random.normal(kx, (B, N_FLOWS, T, D), jnp.float32)
    params = init_params(kp, n_flows=N_FLOWS, n_flow_layers=N_FLOW_LAYERS,
                         input_size=D, hidden=HIDDEN,
                         fusion_neurons=FUSION, output_neurons=OUT)
    lstm_blob, head_blob = prepare_fused_params(
        params, n_flows=N_FLOWS, n_flow_layers=N_FLOW_LAYERS, hidden=HIDDEN,
        input_size=D, fusion_neurons=FUSION, output_neurons=OUT)

    out = n_flow_seq2one_forward(x, lstm_blob, head_blob, n_flows=N_FLOWS,
                                 n_flow_layers=N_FLOW_LAYERS, hidden=HIDDEN,
                                 fusion_neurons=FUSION, output_neurons=OUT)
    out = jax.block_until_ready(out)

    ref = forward_ref(x, params, n_flows=N_FLOWS, n_flow_layers=N_FLOW_LAYERS)
    np.testing.assert_allclose(np.asarray(out), np.asarray(ref),
                               rtol=1e-2, atol=1e-3)
    assert out.shape == (B, OUT)
    print("KERNEL_OK")
</pallas_src>

<mosaic_0001>
module attributes {stable_mosaic.version = 11 : i64} {
  func.func @_fused_kernel(%arg0: memref<64x32xf32, #tpu.memory_space<vmem>>, %arg1: memref<240x256xf32, #tpu.memory_space<vmem>>, %arg2: memref<344x128xf32, #tpu.memory_space<vmem>>, %arg3: memref<8x128xf32, #tpu.memory_space<vmem>>) attributes {dimension_semantics = [], scalar_prefetch = 0 : i64, scratch_operands = 0 : i64, tpu.core_type = #tpu.core_type<tc>} {
    %c0 = arith.constant 0 : index
    %c0_0 = arith.constant 0 : index
    %0 = vector.load %arg1[%c0, %c0_0] : memref<240x256xf32, #tpu.memory_space<vmem>>, vector<32x256xf32>
    %c32 = arith.constant 32 : index
    %c0_1 = arith.constant 0 : index
    %1 = vector.load %arg1[%c32, %c0_1] : memref<240x256xf32, #tpu.memory_space<vmem>>, vector<64x256xf32>
    %c96 = arith.constant 96 : index
    %c0_2 = arith.constant 0 : index
    %2 = vector.load %arg1[%c96, %c0_2] : memref<240x256xf32, #tpu.memory_space<vmem>>, vector<1x256xf32>
    %c104 = arith.constant 104 : index
    %c0_3 = arith.constant 0 : index
    %3 = vector.load %arg1[%c104, %c0_3] : memref<240x256xf32, #tpu.memory_space<vmem>>, vector<64x256xf32>
    %c168 = arith.constant 168 : index
    %c0_4 = arith.constant 0 : index
    %4 = vector.load %arg1[%c168, %c0_4] : memref<240x256xf32, #tpu.memory_space<vmem>>, vector<64x256xf32>
    %c232 = arith.constant 232 : index
    %c0_5 = arith.constant 0 : index
    %5 = vector.load %arg1[%c232, %c0_5] : memref<240x256xf32, #tpu.memory_space<vmem>>, vector<1x256xf32>
    %c0_6 = arith.constant 0 : index
    %c0_7 = arith.constant 0 : index
    %6 = vector.load %arg0[%c0_6, %c0_7] : memref<64x32xf32, #tpu.memory_space<vmem>>, vector<64x32xf32>
    %cst = arith.constant dense<0.000000e+00> : vector<64x256xf32>
    %7 = tpu.matmul %6, %0, %cst {dimension_numbers = #tpu.dot_dimension_numbers<[1], [0], [0], [1], [0, 0, 1, 1], [], []>} : vector<64x32xf32>, vector<32x256xf32>, vector<64x256xf32> -> vector<64x256xf32>
    %8 = vector.broadcast %2 : vector<1x256xf32> to vector<64x256xf32>
    %9 = arith.addf %7, %8 : vector<64x256xf32>
    %cst_8 = arith.constant 0.000000e+00 : f32
    %10 = vector.broadcast %cst_8 : f32 to vector<8x64xf32>
    %cst_9 = arith.constant 0.000000e+00 : f32
    %11 = vector.broadcast %cst_9 : f32 to vector<8x64xf32>
    %cst_10 = arith.constant 0.000000e+00 : f32
    %12 = vector.broadcast %cst_10 : f32 to vector<8x64xf32>
    %cst_11 = arith.constant 0.000000e+00 : f32
    %13 = vector.broadcast %cst_11 : f32 to vector<8x64xf32>
    %14 = vector.extract_strided_slice %9 {offsets = [0, 0], sizes = [8, 256], strides = [1, 1]} : vector<64x256xf32> to vector<8x256xf32>
    %cst_12 = arith.constant dense<0.000000e+00> : vector<8x256xf32>
    %15 = tpu.matmul %10, %1, %cst_12 {dimension_numbers = #tpu.dot_dimension_numbers<[1], [0], [0], [1], [0, 0, 1, 1], [], []>} : vector<8x64xf32>, vector<64x256xf32>, vector<8x256xf32> -> vector<8x256xf32>
    %16 = arith.addf %14, %15 : vector<8x256xf32>
    %17 = arith.negf %16 : vector<8x256xf32>
    %18 = math.exp %17 : vector<8x256xf32>
    %cst_13 = arith.constant 1.000000e+00 : f32
    %19 = vector.broadcast %cst_13 : f32 to vector<8x256xf32>
    %20 = arith.addf %19, %18 : vector<8x256xf32>
    %21 = arith.divf %19, %20 : vector<8x256xf32>
    %22 = vector.extract_strided_slice %21 {offsets = [0, 0], sizes = [8, 64], strides = [1, 1]} : vector<8x256xf32> to vector<8x64xf32>
    %23 = vector.extract_strided_slice %21 {offsets = [0, 64], sizes = [8, 64], strides = [1, 1]} : vector<8x256xf32> to vector<8x64xf32>
    %24 = vector.extract_strided_slice %21 {offsets = [0, 192], sizes = [8, 64], strides = [1, 1]} : vector<8x256xf32> to vector<8x64xf32>
    %25 = vector.extract_strided_slice %16 {offsets = [0, 128], sizes = [8, 64], strides = [1, 1]} : vector<8x256xf32> to vector<8x64xf32>
    %26 = math.tanh %25 : vector<8x64xf32>
    %27 = arith.mulf %23, %12 : vector<8x64xf32>
    %28 = arith.mulf %22, %26 : vector<8x64xf32>
    %29 = arith.addf %27, %28 : vector<8x64xf32>
    %30 = math.tanh %29 : vector<8x64xf32>
    %31 = arith.mulf %24, %30 : vector<8x64xf32>
    %cst_14 = arith.constant dense<0.000000e+00> : vector<8x256xf32>
    %32 = tpu.matmul %31, %3, %cst_14 {dimension_numbers = #tpu.dot_dimension_numbers<[1], [0], [0], [1], [0, 0, 1, 1], [], []>} : vector<8x64xf32>, vector<64x256xf32>, vector<8x256xf32> -> vector<8x256xf32>
    %33 = vector.broadcast %5 : vector<1x256xf32> to vector<8x256xf32>
    %34 = arith.addf %32, %33 : vector<8x256xf32>
    %cst_15 = arith.constant dense<0.000000e+00> : vector<8x256xf32>
    %35 = tpu.matmul %11, %4, %cst_15 {dimension_numbers = #tpu.dot_dimension_numbers<[1], [0], [0], [1], [0, 0, 1, 1], [], []>} : vector<8x64xf32>, vector<64x256xf32>, vector<8x256xf32> -> vector<8x256xf32>
    %36 = arith.addf %34, %35 : vector<8x256xf32>
    %37 = arith.negf %36 : vector<8x256xf32>
    %38 = math.exp %37 : vector<8x256xf32>
    %cst_16 = arith.constant 1.000000e+00 : f32
    %39 = vector.broadcast %cst_16 : f32 to vector<8x256xf32>
    %40 = arith.addf %39, %38 : vector<8x256xf32>
    %41 = arith.divf %39, %40 : vector<8x256xf32>
    %42 = vector.extract_strided_slice %41 {offsets = [0, 0], sizes = [8, 64], strides = [1, 1]} : vector<8x256xf32> to vector<8x64xf32>
    %43 = vector.extract_strided_slice %41 {offsets = [0, 64], sizes = [8, 64], strides = [1, 1]} : vector<8x256xf32> to vector<8x64xf32>
    %44 = vector.extract_strided_slice %41 {offsets = [0, 192], sizes = [8, 64], strides = [1, 1]} : vector<8x256xf32> to vector<8x64xf32>
    %45 = vector.extract_strided_slice %36 {offsets = [0, 128], sizes = [8, 64], strides = [1, 1]} : vector<8x256xf32> to vector<8x64xf32>
    %46 = math.tanh %45 : vector<8x64xf32>
    %47 = arith.mulf %43, %13 : vector<8x64xf32>
    %48 = arith.mulf %42, %46 : vector<8x64xf32>
    %49 = arith.addf %47, %48 : vector<8x64xf32>
    %50 = math.tanh %49 : vector<8x64xf32>
    %51 = arith.mulf %44, %50 : vector<8x64xf32>
    %52 = vector.extract_strided_slice %9 {offsets = [8, 0], sizes = [8, 256], strides = [1, 1]} : vector<64x256xf32> to vector<8x256xf32>
    %cst_17 = arith.constant dense<0.000000e+00> : vector<8x256xf32>
    %53 = tpu.matmul %31, %1, %cst_17 {dimension_numbers = #tpu.dot_dimension_numbers<[1], [0], [0], [1], [0, 0, 1, 1], [], []>} : vector<8x64xf32>, vector<64x256xf32>, vector<8x256xf32> -> vector<8x256xf32>
    %54 = arith.addf %52, %53 : vector<8x256xf32>
    %55 = arith.negf %54 : vector<8x256xf32>
    %56 = math.exp %55 : vector<8x256xf32>
    %cst_18 = arith.constant 1.000000e+00 : f32
    %57 = vector.broadcast %cst_18 : f32 to vector<8x256xf32>
    %58 = arith.addf %57, %56 : vector<8x256xf32>
    %59 = arith.divf %57, %58 : vector<8x256xf32>
    %60 = vector.extract_strided_slice %59 {offsets = [0, 0], sizes = [8, 64], strides = [1, 1]} : vector<8x256xf32> to vector<8x64xf32>
    %61 = vector.extract_strided_slice %59 {offsets = [0, 64], sizes = [8, 64], strides = [1, 1]} : vector<8x256xf32> to vector<8x64xf32>
    %62 = vector.extract_strided_slice %59 {offsets = [0, 192], sizes = [8, 64], strides = [1, 1]} : vector<8x256xf32> to vector<8x64xf32>
    %63 = vector.extract_strided_slice %54 {offsets = [0, 128], sizes = [8, 64], strides = [1, 1]} : vector<8x256xf32> to vector<8x64xf32>
    %64 = math.tanh %63 : vector<8x64xf32>
    %65 = arith.mulf %61, %29 : vector<8x64xf32>
    %66 = arith.mulf %60, %64 : vector<8x64xf32>
    %67 = arith.addf %65, %66 : vector<8x64xf32>
    %68 = math.tanh %67 : vector<8x64xf32>
    %69 = arith.mulf %62, %68 : vector<8x64xf32>
    %cst_19 = arith.constant dense<0.000000e+00> : vector<8x256xf32>
    %70 = tpu.matmul %69, %3, %cst_19 {dimension_numbers = #tpu.dot_dimension_numbers<[1], [0], [0], [1], [0, 0, 1, 1], [], []>} : vector<8x64xf32>, vector<64x256xf32>, vector<8x256xf32> -> vector<8x256xf32>
    %71 = vector.broadcast %5 : vector<1x256xf32> to vector<8x256xf32>
    %72 = arith.addf %70, %71 : vector<8x256xf32>
    %cst_20 = arith.constant dense<0.000000e+00> : vector<8x256xf32>
    %73 = tpu.matmul %51, %4, %cst_20 {dimension_numbers = #tpu.dot_dimension_numbers<[1], [0], [0], [1], [0, 0, 1, 1], [], []>} : vector<8x64xf32>, vector<64x256xf32>, vector<8x256xf32> -> vector<8x256xf32>
    %74 = arith.addf %72, %73 : vector<8x256xf32>
    %75 = arith.negf %74 : vector<8x256xf32>
    %76 = math.exp %75 : vector<8x256xf32>
    %cst_21 = arith.constant 1.000000e+00 : f32
    %77 = vector.broadcast %cst_21 : f32 to vector<8x256xf32>
    %78 = arith.addf %77, %76 : vector<8x256xf32>
    %79 = arith.divf %77, %78 : vector<8x256xf32>
    %80 = vector.extract_strided_slice %79 {offsets = [0, 0], sizes = [8, 64], strides = [1, 1]} : vector<8x256xf32> to vector<8x64xf32>
    %81 = vector.extract_strided_slice %79 {offsets = [0, 64], sizes = [8, 64], strides = [1, 1]} : vector<8x256xf32> to vector<8x64xf32>
    %82 = vector.extract_strided_slice %79 {offsets = [0, 192], sizes = [8, 64], strides = [1, 1]} : vector<8x256xf32> to vector<8x64xf32>
    %83 = vector.extract_strided_slice %74 {offsets = [0, 128], sizes = [8, 64], strides = [1, 1]} : vector<8x256xf32> to vector<8x64xf32>
    %84 = math.tanh %83 : vector<8x64xf32>
    %85 = arith.mulf %81, %49 : vector<8x64xf32>
    %86 = arith.mulf %80, %84 : vector<8x64xf32>
    %87 = arith.addf %85, %86 : vector<8x64xf32>
    %88 = math.tanh %87 : vector<8x64xf32>
    %89 = arith.mulf %82, %88 : vector<8x64xf32>
    %90 = vector.extract_strided_slice %9 {offsets = [16, 0], sizes = [8, 256], strides = [1, 1]} : vector<64x256xf32> to vector<8x256xf32>
    %cst_22 = arith.constant dense<0.000000e+00> : vector<8x256xf32>
    %91 = tpu.matmul %69, %1, %cst_22 {dimension_numbers = #tpu.dot_dimension_numbers<[1], [0], [0], [1], [0, 0, 1, 1], [], []>} : vector<8x64xf32>, vector<64x256xf32>, vector<8x256xf32> -> vector<8x256xf32>
    %92 = arith.addf %90, %91 : vector<8x256xf32>
    %93 = arith.negf %92 : vector<8x256xf32>
    %94 = math.exp %93 : vector<8x256xf32>
    %cst_23 = arith.constant 1.000000e+00 : f32
    %95 = vector.broadcast %cst_23 : f32 to vector<8x256xf32>
    %96 = arith.addf %95, %94 : vector<8x256xf32>
    %97 = arith.divf %95, %96 : vector<8x256xf32>
    %98 = vector.extract_strided_slice %97 {offsets = [0, 0], sizes = [8, 64], strides = [1, 1]} : vector<8x256xf32> to vector<8x64xf32>
    %99 = vector.extract_strided_slice %97 {offsets = [0, 64], sizes = [8, 64], strides = [1, 1]} : vector<8x256xf32> to vector<8x64xf32>
    %100 = vector.extract_strided_slice %97 {offsets = [0, 192], sizes = [8, 64], strides = [1, 1]} : vector<8x256xf32> to vector<8x64xf32>
    %101 = vector.extract_strided_slice %92 {offsets = [0, 128], sizes = [8, 64], strides = [1, 1]} : vector<8x256xf32> to vector<8x64xf32>
    %102 = math.tanh %101 : vector<8x64xf32>
    %103 = arith.mulf %99, %67 : vector<8x64xf32>
    %104 = arith.mulf %98, %102 : vector<8x64xf32>
    %105 = arith.addf %103, %104 : vector<8x64xf32>
    %106 = math.tanh %105 : vector<8x64xf32>
    %107 = arith.mulf %100, %106 : vector<8x64xf32>
    %cst_24 = arith.constant dense<0.000000e+00> : vector<8x256xf32>
    %108 = tpu.matmul %107, %3, %cst_24 {dimension_numbers = #tpu.dot_dimension_numbers<[1], [0], [0], [1], [0, 0, 1, 1], [], []>} : vector<8x64xf32>, vector<64x256xf32>, vector<8x256xf32> -> vector<8x256xf32>
    %109 = vector.broadcast %5 : vector<1x256xf32> to vector<8x256xf32>
    %110 = arith.addf %108, %109 : vector<8x256xf32>
    %cst_25 = arith.constant dense<0.000000e+00> : vector<8x256xf32>
    %111 = tpu.matmul %89, %4, %cst_25 {dimension_numbers = #tpu.dot_dimension_numbers<[1], [0], [0], [1], [0, 0, 1, 1], [], []>} : vector<8x64xf32>, vector<64x256xf32>, vector<8x256xf32> -> vector<8x256xf32>
    %112 = arith.addf %110, %111 : vector<8x256xf32>
    %113 = arith.negf %112 : vector<8x256xf32>
    %114 = math.exp %113 : vector<8x256xf32>
    %cst_26 = arith.constant 1.000000e+00 : f32
    %115 = vector.broadcast %cst_26 : f32 to vector<8x256xf32>
    %116 = arith.addf %115, %114 : vector<8x256xf32>
    %117 = arith.divf %115, %116 : vector<8x256xf32>
    %118 = vector.extract_strided_slice %117 {offsets = [0, 0], sizes = [8, 64], strides = [1, 1]} : vector<8x256xf32> to vector<8x64xf32>
    %119 = vector.extract_strided_slice %117 {offsets = [0, 64], sizes = [8, 64], strides = [1, 1]} : vector<8x256xf32> to vector<8x64xf32>
    %120 = vector.extract_strided_slice %117 {offsets = [0, 192], sizes = [8, 64], strides = [1, 1]} : vector<8x256xf32> to vector<8x64xf32>
    %121 = vector.extract_strided_slice %112 {offsets = [0, 128], sizes = [8, 64], strides = [1, 1]} : vector<8x256xf32> to vector<8x64xf32>
    %122 = math.tanh %121 : vector<8x64xf32>
    %123 = arith.mulf %119, %87 : vector<8x64xf32>
    %124 = arith.mulf %118, %122 : vector<8x64xf32>
    %125 = arith.addf %123, %124 : vector<8x64xf32>
    %126 = math.tanh %125 : vector<8x64xf32>
    %127 = arith.mulf %120, %126 : vector<8x64xf32>
    %128 = vector.extract_strided_slice %9 {offsets = [24, 0], sizes = [8, 256], strides = [1, 1]} : vector<64x256xf32> to vector<8x256xf32>
    %cst_27 = arith.constant dense<0.000000e+00> : vector<8x256xf32>
    %129 = tpu.matmul %107, %1, %cst_27 {dimension_numbers = #tpu.dot_dimension_numbers<[1], [0], [0], [1], [0, 0, 1, 1], [], []>} : vector<8x64xf32>, vector<64x256xf32>, vector<8x256xf32> -> vector<8x256xf32>
    %130 = arith.addf %128, %129 : vector<8x256xf32>
    %131 = arith.negf %130 : vector<8x256xf32>
    %132 = math.exp %131 : vector<8x256xf32>
    %cst_28 = arith.constant 1.000000e+00 : f32
    %133 = vector.broadcast %cst_28 : f32 to vector<8x256xf32>
    %134 = arith.addf %133, %132 : vector<8x256xf32>
    %135 = arith.divf %133, %134 : vector<8x256xf32>
    %136 = vector.extract_strided_slice %135 {offsets = [0, 0], sizes = [8, 64], strides = [1, 1]} : vector<8x256xf32> to vector<8x64xf32>
    %137 = vector.extract_strided_slice %135 {offsets = [0, 64], sizes = [8, 64], strides = [1, 1]} : vector<8x256xf32> to vector<8x64xf32>
    %138 = vector.extract_strided_slice %135 {offsets = [0, 192], sizes = [8, 64], strides = [1, 1]} : vector<8x256xf32> to vector<8x64xf32>
    %139 = vector.extract_strided_slice %130 {offsets = [0, 128], sizes = [8, 64], strides = [1, 1]} : vector<8x256xf32> to vector<8x64xf32>
    %140 = math.tanh %139 : vector<8x64xf32>
    %141 = arith.mulf %137, %105 : vector<8x64xf32>
    %142 = arith.mulf %136, %140 : vector<8x64xf32>
    %143 = arith.addf %141, %142 : vector<8x64xf32>
    %144 = math.tanh %143 : vector<8x64xf32>
    %145 = arith.mulf %138, %144 : vector<8x64xf32>
    %cst_29 = arith.constant dense<0.000000e+00> : vector<8x256xf32>
    %146 = tpu.matmul %145, %3, %cst_29 {dimension_numbers = #tpu.dot_dimension_numbers<[1], [0], [0], [1], [0, 0, 1, 1], [], []>} : vector<8x64xf32>, vector<64x256xf32>, vector<8x256xf32> -> vector<8x256xf32>
    %147 = vector.broadcast %5 : vector<1x256xf32> to vector<8x256xf32>
    %148 = arith.addf %146, %147 : vector<8x256xf32>
    %cst_30 = arith.constant dense<0.000000e+00> : vector<8x256xf32>
    %149 = tpu.matmul %127, %4, %cst_30 {dimension_numbers = #tpu.dot_dimension_numbers<[1], [0], [0], [1], [0, 0, 1, 1], [], []>} : vector<8x64xf32>, vector<64x256xf32>, vector<8x256xf32> -> vector<8x256xf32>
    %150 = arith.addf %148, %149 : vector<8x256xf32>
    %151 = arith.negf %150 : vector<8x256xf32>
    %152 = math.exp %151 : vector<8x256xf32>
    %cst_31 = arith.constant 1.000000e+00 : f32
    %153 = vector.broadcast %cst_31 : f32 to vector<8x256xf32>
    %154 = arith.addf %153, %152 : vector<8x256xf32>
    %155 = arith.divf %153, %154 : vector<8x256xf32>
    %156 = vector.extract_strided_slice %155 {offsets = [0, 0], sizes = [8, 64], strides = [1, 1]} : vector<8x256xf32> to vector<8x64xf32>
    %157 = vector.extract_strided_slice %155 {offsets = [0, 64], sizes = [8, 64], strides = [1, 1]} : vector<8x256xf32> to vector<8x64xf32>
    %158 = vector.extract_strided_slice %155 {offsets = [0, 192], sizes = [8, 64], strides = [1, 1]} : vector<8x256xf32> to vector<8x64xf32>
    %159 = vector.extract_strided_slice %150 {offsets = [0, 128], sizes = [8, 64], strides = [1, 1]} : vector<8x256xf32> to vector<8x64xf32>
    %160 = math.tanh %159 : vector<8x64xf32>
    %161 = arith.mulf %157, %125 : vector<8x64xf32>
    %162 = arith.mulf %156, %160 : vector<8x64xf32>
    %163 = arith.addf %161, %162 : vector<8x64xf32>
    %164 = math.tanh %163 : vector<8x64xf32>
    %165 = arith.mulf %158, %164 : vector<8x64xf32>
    %166 = vector.extract_strided_slice %9 {offsets = [32, 0], sizes = [8, 256], strides = [1, 1]} : vector<64x256xf32> to vector<8x256xf32>
    %cst_32 = arith.constant dense<0.000000e+00> : vector<8x256xf32>
    %167 = tpu.matmul %145, %1, %cst_32 {dimension_numbers = #tpu.dot_dimension_numbers<[1], [0], [0], [1], [0, 0, 1, 1], [], []>} : vector<8x64xf32>, vector<64x256xf32>, vector<8x256xf32> -> vector<8x256xf32>
    %168 = arith.addf %166, %167 : vector<8x256xf32>
    %169 = arith.negf %168 : vector<8x256xf32>
    %170 = math.exp %169 : vector<8x256xf32>
    %cst_33 = arith.constant 1.000000e+00 : f32
    %171 = vector.broadcast %cst_33 : f32 to vector<8x256xf32>
    %172 = arith.addf %171, %170 : vector<8x256xf32>
    %173 = arith.divf %171, %172 : vector<8x256xf32>
    %174 = vector.extract_strided_slice %173 {offsets = [0, 0], sizes = [8, 64], strides = [1, 1]} : vector<8x256xf32> to vector<8x64xf32>
    %175 = vector.extract_strided_slice %173 {offsets = [0, 64], sizes = [8, 64], strides = [1, 1]} : vector<8x256xf32> to vector<8x64xf32>
    %176 = vector.extract_strided_slice %173 {offsets = [0, 192], sizes = [8, 64], strides = [1, 1]} : vector<8x256xf32> to vector<8x64xf32>
    %177 = vector.extract_strided_slice %168 {offsets = [0, 128], sizes = [8, 64], strides = [1, 1]} : vector<8x256xf32> to vector<8x64xf32>
    %178 = math.tanh %177 : vector<8x64xf32>
    %179 = arith.mulf %175, %143 : vector<8x64xf32>
    %180 = arith.mulf %174, %178 : vector<8x64xf32>
    %181 = arith.addf %179, %180 : vector<8x64xf32>
    %182 = math.tanh %181 : vector<8x64xf32>
    %183 = arith.mulf %176, %182 : vector<8x64xf32>
    %cst_34 = arith.constant dense<0.000000e+00> : vector<8x256xf32>
    %184 = tpu.matmul %183, %3, %cst_34 {dimension_numbers = #tpu.dot_dimension_numbers<[1], [0], [0], [1], [0, 0, 1, 1], [], []>} : vector<8x64xf32>, vector<64x256xf32>, vector<8x256xf32> -> vector<8x256xf32>
    %185 = vector.broadcast %5 : vector<1x256xf32> to vector<8x256xf32>
    %186 = arith.addf %184, %185 : vector<8x256xf32>
    %cst_35 = arith.constant dense<0.000000e+00> : vector<8x256xf32>
    %187 = tpu.matmul %165, %4, %cst_35 {dimension_numbers = #tpu.dot_dimension_numbers<[1], [0], [0], [1], [0, 0, 1, 1], [], []>} : vector<8x64xf32>, vector<64x256xf32>, vector<8x256xf32> -> vector<8x256xf32>
    %188 = arith.addf %186, %187 : vector<8x256xf32>
    %189 = arith.negf %188 : vector<8x256xf32>
    %190 = math.exp %189 : vector<8x256xf32>
    %cst_36 = arith.constant 1.000000e+00 : f32
    %191 = vector.broadcast %cst_36 : f32 to vector<8x256xf32>
    %192 = arith.addf %191, %190 : vector<8x256xf32>
    %193 = arith.divf %191, %192 : vector<8x256xf32>
    %194 = vector.extract_strided_slice %193 {offsets = [0, 0], sizes = [8, 64], strides = [1, 1]} : vector<8x256xf32> to vector<8x64xf32>
    %195 = vector.extract_strided_slice %193 {offsets = [0, 64], sizes = [8, 64], strides = [1, 1]} : vector<8x256xf32> to vector<8x64xf32>
    %196 = vector.extract_strided_slice %193 {offsets = [0, 192], sizes = [8, 64], strides = [1, 1]} : vector<8x256xf32> to vector<8x64xf32>
    %197 = vector.extract_strided_slice %188 {offsets = [0, 128], sizes = [8, 64], strides = [1, 1]} : vector<8x256xf32> to vector<8x64xf32>
    %198 = math.tanh %197 : vector<8x64xf32>
    %199 = arith.mulf %195, %163 : vector<8x64xf32>
    %200 = arith.mulf %194, %198 : vector<8x64xf32>
    %201 = arith.addf %199, %200 : vector<8x64xf32>
    %202 = math.tanh %201 : vector<8x64xf32>
    %203 = arith.mulf %196, %202 : vector<8x64xf32>
    %204 = vector.extract_strided_slice %9 {offsets = [40, 0], sizes = [8, 256], strides = [1, 1]} : vector<64x256xf32> to vector<8x256xf32>
    %cst_37 = arith.constant dense<0.000000e+00> : vector<8x256xf32>
    %205 = tpu.matmul %183, %1, %cst_37 {dimension_numbers = #tpu.dot_dimension_numbers<[1], [0], [0], [1], [0, 0, 1, 1], [], []>} : vector<8x64xf32>, vector<64x256xf32>, vector<8x256xf32> -> vector<8x256xf32>
    %206 = arith.addf %204, %205 : vector<8x256xf32>
    %207 = arith.negf %206 : vector<8x256xf32>
    %208 = math.exp %207 : vector<8x256xf32>
    %cst_38 = arith.constant 1.000000e+00 : f32
    %209 = vector.broadcast %cst_38 : f32 to vector<8x256xf32>
    %210 = arith.addf %209, %208 : vector<8x256xf32>
    %211 = arith.divf %209, %210 : vector<8x256xf32>
    %212 = vector.extract_strided_slice %211 {offsets = [0, 0], sizes = [8, 64], strides = [1, 1]} : vector<8x256xf32> to vector<8x64xf32>
    %213 = vector.extract_strided_slice %211 {offsets = [0, 64], sizes = [8, 64], strides = [1, 1]} : vector<8x256xf32> to vector<8x64xf32>
    %214 = vector.extract_strided_slice %211 {offsets = [0, 192], sizes = [8, 64], strides = [1, 1]} : vector<8x256xf32> to vector<8x64xf32>
    %215 = vector.extract_strided_slice %206 {offsets = [0, 128], sizes = [8, 64], strides = [1, 1]} : vector<8x256xf32> to vector<8x64xf32>
    %216 = math.tanh %215 : vector<8x64xf32>
    %217 = arith.mulf %213, %181 : vector<8x64xf32>
    %218 = arith.mulf %212, %216 : vector<8x64xf32>
    %219 = arith.addf %217, %218 : vector<8x64xf32>
    %220 = math.tanh %219 : vector<8x64xf32>
    %221 = arith.mulf %214, %220 : vector<8x64xf32>
    %cst_39 = arith.constant dense<0.000000e+00> : vector<8x256xf32>
    %222 = tpu.matmul %221, %3, %cst_39 {dimension_numbers = #tpu.dot_dimension_numbers<[1], [0], [0], [1], [0, 0, 1, 1], [], []>} : vector<8x64xf32>, vector<64x256xf32>, vector<8x256xf32> -> vector<8x256xf32>
    %223 = vector.broadcast %5 : vector<1x256xf32> to vector<8x256xf32>
    %224 = arith.addf %222, %223 : vector<8x256xf32>
    %cst_40 = arith.constant dense<0.000000e+00> : vector<8x256xf32>
    %225 = tpu.matmul %203, %4, %cst_40 {dimension_numbers = #tpu.dot_dimension_numbers<[1], [0], [0], [1], [0, 0, 1, 1], [], []>} : vector<8x64xf32>, vector<64x256xf32>, vector<8x256xf32> -> vector<8x256xf32>
    %226 = arith.addf %224, %225 : vector<8x256xf32>
    %227 = arith.negf %226 : vector<8x256xf32>
    %228 = math.exp %227 : vector<8x256xf32>
    %cst_41 = arith.constant 1.000000e+00 : f32
    %229 = vector.broadcast %cst_41 : f32 to vector<8x256xf32>
    %230 = arith.addf %229, %228 : vector<8x256xf32>
    %231 = arith.divf %229, %230 : vector<8x256xf32>
    %232 = vector.extract_strided_slice %231 {offsets = [0, 0], sizes = [8, 64], strides = [1, 1]} : vector<8x256xf32> to vector<8x64xf32>
    %233 = vector.extract_strided_slice %231 {offsets = [0, 64], sizes = [8, 64], strides = [1, 1]} : vector<8x256xf32> to vector<8x64xf32>
    %234 = vector.extract_strided_slice %231 {offsets = [0, 192], sizes = [8, 64], strides = [1, 1]} : vector<8x256xf32> to vector<8x64xf32>
    %235 = vector.extract_strided_slice %226 {offsets = [0, 128], sizes = [8, 64], strides = [1, 1]} : vector<8x256xf32> to vector<8x64xf32>
    %236 = math.tanh %235 : vector<8x64xf32>
    %237 = arith.mulf %233, %201 : vector<8x64xf32>
    %238 = arith.mulf %232, %236 : vector<8x64xf32>
    %239 = arith.addf %237, %238 : vector<8x64xf32>
    %240 = math.tanh %239 : vector<8x64xf32>
    %241 = arith.mulf %234, %240 : vector<8x64xf32>
    %242 = vector.extract_strided_slice %9 {offsets = [48, 0], sizes = [8, 256], strides = [1, 1]} : vector<64x256xf32> to vector<8x256xf32>
    %cst_42 = arith.constant dense<0.000000e+00> : vector<8x256xf32>
    %243 = tpu.matmul %221, %1, %cst_42 {dimension_numbers = #tpu.dot_dimension_numbers<[1], [0], [0], [1], [0, 0, 1, 1], [], []>} : vector<8x64xf32>, vector<64x256xf32>, vector<8x256xf32> -> vector<8x256xf32>
    %244 = arith.addf %242, %243 : vector<8x256xf32>
    %245 = arith.negf %244 : vector<8x256xf32>
    %246 = math.exp %245 : vector<8x256xf32>
    %cst_43 = arith.constant 1.000000e+00 : f32
    %247 = vector.broadcast %cst_43 : f32 to vector<8x256xf32>
    %248 = arith.addf %247, %246 : vector<8x256xf32>
    %249 = arith.divf %247, %248 : vector<8x256xf32>
    %250 = vector.extract_strided_slice %249 {offsets = [0, 0], sizes = [8, 64], strides = [1, 1]} : vector<8x256xf32> to vector<8x64xf32>
    %251 = vector.extract_strided_slice %249 {offsets = [0, 64], sizes = [8, 64], strides = [1, 1]} : vector<8x256xf32> to vector<8x64xf32>
    %252 = vector.extract_strided_slice %249 {offsets = [0, 192], sizes = [8, 64], strides = [1, 1]} : vector<8x256xf32> to vector<8x64xf32>
    %253 = vector.extract_strided_slice %244 {offsets = [0, 128], sizes = [8, 64], strides = [1, 1]} : vector<8x256xf32> to vector<8x64xf32>
    %254 = math.tanh %253 : vector<8x64xf32>
    %255 = arith.mulf %251, %219 : vector<8x64xf32>
    %256 = arith.mulf %250, %254 : vector<8x64xf32>
    %257 = arith.addf %255, %256 : vector<8x64xf32>
    %258 = math.tanh %257 : vector<8x64xf32>
    %259 = arith.mulf %252, %258 : vector<8x64xf32>
    %cst_44 = arith.constant dense<0.000000e+00> : vector<8x256xf32>
    %260 = tpu.matmul %259, %3, %cst_44 {dimension_numbers = #tpu.dot_dimension_numbers<[1], [0], [0], [1], [0, 0, 1, 1], [], []>} : vector<8x64xf32>, vector<64x256xf32>, vector<8x256xf32> -> vector<8x256xf32>
    %261 = vector.broadcast %5 : vector<1x256xf32> to vector<8x256xf32>
    %262 = arith.addf %260, %261 : vector<8x256xf32>
    %cst_45 = arith.constant dense<0.000000e+00> : vector<8x256xf32>
    %263 = tpu.matmul %241, %4, %cst_45 {dimension_numbers = #tpu.dot_dimension_numbers<[1], [0], [0], [1], [0, 0, 1, 1], [], []>} : vector<8x64xf32>, vector<64x256xf32>, vector<8x256xf32> -> vector<8x256xf32>
    %264 = arith.addf %262, %263 : vector<8x256xf32>
    %265 = arith.negf %264 : vector<8x256xf32>
    %266 = math.exp %265 : vector<8x256xf32>
    %cst_46 = arith.constant 1.000000e+00 : f32
    %267 = vector.broadcast %cst_46 : f32 to vector<8x256xf32>
    %268 = arith.addf %267, %266 : vector<8x256xf32>
    %269 = arith.divf %267, %268 : vector<8x256xf32>
    %270 = vector.extract_strided_slice %269 {offsets = [0, 0], sizes = [8, 64], strides = [1, 1]} : vector<8x256xf32> to vector<8x64xf32>
    %271 = vector.extract_strided_slice %269 {offsets = [0, 64], sizes = [8, 64], strides = [1, 1]} : vector<8x256xf32> to vector<8x64xf32>
    %272 = vector.extract_strided_slice %269 {offsets = [0, 192], sizes = [8, 64], strides = [1, 1]} : vector<8x256xf32> to vector<8x64xf32>
    %273 = vector.extract_strided_slice %264 {offsets = [0, 128], sizes = [8, 64], strides = [1, 1]} : vector<8x256xf32> to vector<8x64xf32>
    %274 = math.tanh %273 : vector<8x64xf32>
    %275 = arith.mulf %271, %239 : vector<8x64xf32>
    %276 = arith.mulf %270, %274 : vector<8x64xf32>
    %277 = arith.addf %275, %276 : vector<8x64xf32>
    %278 = math.tanh %277 : vector<8x64xf32>
    %279 = arith.mulf %272, %278 : vector<8x64xf32>
    %280 = vector.extract_strided_slice %9 {offsets = [56, 0], sizes = [8, 256], strides = [1, 1]} : vector<64x256xf32> to vector<8x256xf32>
    %cst_47 = arith.constant dense<0.000000e+00> : vector<8x256xf32>
    %281 = tpu.matmul %259, %1, %cst_47 {dimension_numbers = #tpu.dot_dimension_numbers<[1], [0], [0], [1], [0, 0, 1, 1], [], []>} : vector<8x64xf32>, vector<64x256xf32>, vector<8x256xf32> -> vector<8x256xf32>
    %282 = arith.addf %280, %281 : vector<8x256xf32>
    %283 = arith.negf %282 : vector<8x256xf32>
    %284 = math.exp %283 : vector<8x256xf32>
    %cst_48 = arith.constant 1.000000e+00 : f32
    %285 = vector.broadcast %cst_48 : f32 to vector<8x256xf32>
    %286 = arith.addf %285, %284 : vector<8x256xf32>
    %287 = arith.divf %285, %286 : vector<8x256xf32>
    %288 = vector.extract_strided_slice %287 {offsets = [0, 0], sizes = [8, 64], strides = [1, 1]} : vector<8x256xf32> to vector<8x64xf32>
    %289 = vector.extract_strided_slice %287 {offsets = [0, 64], sizes = [8, 64], strides = [1, 1]} : vector<8x256xf32> to vector<8x64xf32>
    %290 = vector.extract_strided_slice %287 {offsets = [0, 192], sizes = [8, 64], strides = [1, 1]} : vector<8x256xf32> to vector<8x64xf32>
    %291 = vector.extract_strided_slice %282 {offsets = [0, 128], sizes = [8, 64], strides = [1, 1]} : vector<8x256xf32> to vector<8x64xf32>
    %292 = math.tanh %291 : vector<8x64xf32>
    %293 = arith.mulf %289, %257 : vector<8x64xf32>
    %294 = arith.mulf %288, %292 : vector<8x64xf32>
    %295 = arith.addf %293, %294 : vector<8x64xf32>
    %296 = math.tanh %295 : vector<8x64xf32>
    %297 = arith.mulf %290, %296 : vector<8x64xf32>
    %cst_49 = arith.constant dense<0.000000e+00> : vector<8x256xf32>
    %298 = tpu.matmul %297, %3, %cst_49 {dimension_numbers = #tpu.dot_dimension_numbers<[1], [0], [0], [1], [0, 0, 1, 1], [], []>} : vector<8x64xf32>, vector<64x256xf32>, vector<8x256xf32> -> vector<8x256xf32>
    %299 = vector.broadcast %5 : vector<1x256xf32> to vector<8x256xf32>
    %300 = arith.addf %298, %299 : vector<8x256xf32>
    %cst_50 = arith.constant dense<0.000000e+00> : vector<8x256xf32>
    %301 = tpu.matmul %279, %4, %cst_50 {dimension_numbers = #tpu.dot_dimension_numbers<[1], [0], [0], [1], [0, 0, 1, 1], [], []>} : vector<8x64xf32>, vector<64x256xf32>, vector<8x256xf32> -> vector<8x256xf32>
    %302 = arith.addf %300, %301 : vector<8x256xf32>
    %303 = arith.negf %302 : vector<8x256xf32>
    %304 = math.exp %303 : vector<8x256xf32>
    %cst_51 = arith.constant 1.000000e+00 : f32
    %305 = vector.broadcast %cst_51 : f32 to vector<8x256xf32>
    %306 = arith.addf %305, %304 : vector<8x256xf32>
    %307 = arith.divf %305, %306 : vector<8x256xf32>
    %308 = vector.extract_strided_slice %307 {offsets = [0, 0], sizes = [8, 64], strides = [1, 1]} : vector<8x256xf32> to vector<8x64xf32>
    %309 = vector.extract_strided_slice %307 {offsets = [0, 64], sizes = [8, 64], strides = [1, 1]} : vector<8x256xf32> to vector<8x64xf32>
    %310 = vector.extract_strided_slice %307 {offsets = [0, 192], sizes = [8, 64], strides = [1, 1]} : vector<8x256xf32> to vector<8x64xf32>
    %311 = vector.extract_strided_slice %302 {offsets = [0, 128], sizes = [8, 64], strides = [1, 1]} : vector<8x256xf32> to vector<8x64xf32>
    %312 = math.tanh %311 : vector<8x64xf32>
    %313 = arith.mulf %309, %277 : vector<8x64xf32>
    %314 = arith.mulf %308, %312 : vector<8x64xf32>
    %315 = arith.addf %313, %314 : vector<8x64xf32>
    %316 = math.tanh %315 : vector<8x64xf32>
    %317 = arith.mulf %310, %316 : vector<8x64xf32>
    %c0_52 = arith.constant 0 : index
    %c0_53 = arith.constant 0 : index
    %318 = vector.load %arg2[%c0_52, %c0_53] : memref<344x128xf32, #tpu.memory_space<vmem>>, vector<64x128xf32>
    %c64 = arith.constant 64 : index
    %c0_54 = arith.constant 0 : index
    %319 = vector.load %arg2[%c64, %c0_54] : memref<344x128xf32, #tpu.memory_space<vmem>>, vector<1x128xf32>
    %c72 = arith.constant 72 : index
    %c0_55 = arith.constant 0 : index
    %320 = vector.load %arg2[%c72, %c0_55] : memref<344x128xf32, #tpu.memory_space<vmem>>, vector<128x128xf32>
    %c200 = arith.constant 200 : index
    %c0_56 = arith.constant 0 : index
    %321 = vector.load %arg2[%c200, %c0_56] : memref<344x128xf32, #tpu.memory_space<vmem>>, vector<1x128xf32>
    %c208 = arith.constant 208 : index
    %c0_57 = arith.constant 0 : index
    %322 = vector.load %arg2[%c208, %c0_57] : memref<344x128xf32, #tpu.memory_space<vmem>>, vector<128x128xf32>
    %c336 = arith.constant 336 : index
    %c0_58 = arith.constant 0 : index
    %323 = vector.load %arg2[%c336, %c0_58] : memref<344x128xf32, #tpu.memory_space<vmem>>, vector<1x128xf32>
    %cst_59 = arith.constant dense<0.000000e+00> : vector<8x128xf32>
    %324 = tpu.matmul %317, %318, %cst_59 {dimension_numbers = #tpu.dot_dimension_numbers<[1], [0], [0], [1], [0, 0, 1, 1], [], []>} : vector<8x64xf32>, vector<64x128xf32>, vector<8x128xf32> -> vector<8x128xf32>
    %325 = vector.broadcast %319 : vector<1x128xf32> to vector<8x128xf32>
    %326 = arith.addf %324, %325 : vector<8x128xf32>
    %327 = math.tanh %326 : vector<8x128xf32>
    %cst_60 = arith.constant dense<0.000000e+00> : vector<8x128xf32>
    %328 = tpu.matmul %327, %320, %cst_60 {dimension_numbers = #tpu.dot_dimension_numbers<[1], [0], [0], [1], [0, 0, 1, 1], [], []>} : vector<8x128xf32>, vector<128x128xf32>, vector<8x128xf32> -> vector<8x128xf32>
    %329 = vector.broadcast %321 : vector<1x128xf32> to vector<8x128xf32>
    %330 = arith.addf %328, %329 : vector<8x128xf32>
    %331 = math.tanh %330 : vector<8x128xf32>
    %cst_61 = arith.constant dense<0.000000e+00> : vector<8x128xf32>
    %332 = tpu.matmul %331, %322, %cst_61 {dimension_numbers = #tpu.dot_dimension_numbers<[1], [0], [0], [1], [0, 0, 1, 1], [], []>} : vector<8x128xf32>, vector<128x128xf32>, vector<8x128xf32> -> vector<8x128xf32>
    %333 = vector.broadcast %323 : vector<1x128xf32> to vector<8x128xf32>
    %334 = arith.addf %332, %333 : vector<8x128xf32>
    %cst_62 = arith.constant dense<0xFF800000> : vector<8xf32>
    %335 = vector.multi_reduction <maximumf>, %334, %cst_62 [1] : vector<8x128xf32> to vector<8xf32>
    %336 = vector.shape_cast %335 : vector<8xf32> to vector<8x1xf32>
    %337 = vector.broadcast %336 : vector<8x1xf32> to vector<8x128xf32>
    %338 = arith.subf %334, %337 : vector<8x128xf32>
    %339 = math.exp %338 : vector<8x128xf32>
    %cst_63 = arith.constant dense<0.000000e+00> : vector<8xf32>
    %340 = vector.multi_reduction <add>, %339, %cst_63 [1] : vector<8x128xf32> to vector<8xf32>
    %341 = vector.shape_cast %340 : vector<8xf32> to vector<8x1xf32>
    %342 = vector.broadcast %341 : vector<8x1xf32> to vector<8x128xf32>
    %343 = arith.divf %339, %342 : vector<8x128xf32>
    %c0_64 = arith.constant 0 : index
    %c0_65 = arith.constant 0 : index
    %344 = vector.load %arg3[%c0_64, %c0_65] : memref<8x128xf32, #tpu.memory_space<vmem>>, vector<8x128xf32>
    tpu.vector_store %arg3[%c0_64, %c0_65], %343 {strides = array<i32>} : memref<8x128xf32, #tpu.memory_space<vmem>>, vector<8x128xf32>,
    return
  }
}

</mosaic_0001>

<bundles_post_ra>
// kernel: n_flow_seq2one_forward.1
= control target key start
LH: loop header
LB: loop body
LE: loop exit
PB: predicated region body
PF: predicated region fallthrough
CT: control target
= control target key end

     0   :  { %8 = vsyncpa [#allocation3], 0  ;;  %s4157_s0 = inlined_call_operand.vmem [shape: f32[64,32], index: 0, kind: input, shape index: {}]   ;;  %s4158_s1 = inlined_call_operand.hbm [shape: f32[240,256], index: 1, kind: input, shape index: {}]   ;;  %s4159_s2 = inlined_call_operand.hbm [shape: f32[344,128], index: 2, kind: input, shape index: {}]   ;;  %s4160_s3 = inlined_call_operand.vmem [shape: f32[8,128], index: 3, kind: output, shape index: {}]  }
   0x1   :  { %9 = vsyncpa [#allocation5], 0  ;;  %s3224_s12 = smov [#allocation2]  }
   0x2   :  { %s17_s13 = sshll.u32 %s3224_s12, 4  ;;  %s18_s13 = int_to_ptr.vmem [resolvable:$true] %s17_s13 }
   0x3   :  { %s3188_s14 = scalar_lea.vmem %s18_s13, 7680  ;;  %p3193_p1 = scmp.lt.s32.totalorder %s18_s13, %s18_s13 }
   0x4   :  { %p3189_p0 = scmp.ne.s32.totalorder %s18_s13, %s3188_s14  ;;  %p3194_p2 = scmp.lt.s32.totalorder %s3188_s14, %s3188_s14 }
   0x6   :  { %p3195_p3 = por %p3194_p2, %p3193_p1 }
   0x8   :  { %p3196_p4 = pnand %p3195_p3, %p3189_p0 }
   0xa   :  { %3199 = shalt.err (!%p3196_p4)
}
   0xb   :  { %s3225_s15 = smov 256   ;;  %s3226_s16 = smov 16  }
   0xc   :  { %23 = dma.hbm_to_vmem [thread:$0]  %s4158_s1, 7680, %s18_s13, [#allocation3], %s3225_s15, %s3225_s15, %s3226_s16  }
   0xd   :  { %s3227_s19 = smov [#allocation4]  }
   0xe   :  { %s29_s20 = sshll.u32 %s3227_s19, 4  ;;  %s30_s20 = int_to_ptr.vmem [resolvable:$true] %s29_s20 }
   0xf   :  { %s3208_s21 = scalar_lea.vmem %s30_s20, 5504  ;;  %p3213_p6 = scmp.lt.s32.totalorder %s30_s20, %s30_s20 }
  0x10   :  { %p3209_p5 = scmp.ne.s32.totalorder %s30_s20, %s3208_s21  ;;  %p3214_p7 = scmp.lt.s32.totalorder %s3208_s21, %s3208_s21 }
  0x12   :  { %p3215_p8 = por %p3214_p7, %p3213_p6 }
  0x14   :  { %p3216_p9 = pnand %p3215_p8, %p3209_p5 }
  0x16   :  { %3219 = shalt.err (!%p3216_p9)
}
  0x17   :  { %s3228_s22 = smov 128   ;;  %s3229_s23 = smov 8  }
  0x18   :  { %35 = dma.hbm_to_vmem [thread:$0]  %s4159_s2, 5504, %s30_s20, [#allocation5], %s3228_s22, %s3228_s22, %s3229_s23  }
  0x19   :  { %3220 = dma.done.wait [#allocation3], 7680  }
  0x1a   :  { %3221 = vsyncadd [#allocation3], 4294959616 }
  0x1b   :  { %3222 = dma.done.wait [#allocation5], 5504  }
  0x1c   :  { %3223 = vsyncadd [#allocation5], 4294961792  ;;  %v4161_v0 = vmov 0.0   ;;  %v3261_v1 = vld [vmem:[#allocation2 + $0xb8] sm:$0xff]  ;;  %v3263_v2 = vld [vmem:[#allocation2 + $0xb0] sm:$0xff]  ;;  %vm121_vm0 = vcmask 261120   ;;  %v111_v26 = vlaneseq }
  0x1d   :  { %210 = vmatprep.mubr.f32.mxu0 %v4161_v0  ;;  %327 = vmatprep.mubr.f32.mxu1 %v4161_v0  ;;  %v3265_v3 = vld [vmem:[#allocation2 + $0xa8] sm:$0xff]  ;;  %v3268_v4 = vld [vmem:[#allocation2 + $0xa0] sm:$0xff]  ;;  %v49_v5 = vld [vmem:[#allocation2 + $0x38] sm:$0xff]  ;;  %s3231_s26 = smov 64   ;;  %vm259_vm1 = vcmask 523264   ;;  %vm3232_vm2 = vmmov 0  }
  0x1e   :  { %279 = vmatprep.subr.mxu1 %v3261_v1  ;;  %170 = vmatprep.subr.mxu0 %v49_v5  ;;  %v3271_v6 = vld [vmem:[#allocation2 + $0x98] sm:$0xff]  ;;  %v48_v7 = vld [vmem:[#allocation2 + $0x30] sm:$0xff]  ;;  %v47_v8 = vld [vmem:[#allocation2 + $0x28] sm:$0xff]  ;;  %v3316_v27 = vshrl.u32 %v111_v26, 7 }
  0x1f   :  { %280 = vmatpush1.msra.mxu1 %v3263_v2  ;;  %171 = vmatpush1.msra.mxu0 %v48_v7  ;;  %v3274_v9 = vld [vmem:[#allocation2 + $0x90] sm:$0xff]  ;;  %v46_v10 = vld [vmem:[#allocation2 + $0x20] sm:$0xff]  ;;  %v3277_v11 = vld [vmem:[#allocation2 + $0x88] sm:$0xff] }
  0x20   :  { %281 = vmatprep.subr.mxu1 %v3265_v3  ;;  %172 = vmatprep.subr.mxu0 %v47_v8  ;;  %v45_v12 = vld [vmem:[#allocation2 + $0x18] sm:$0xff]  ;;  %v44_v13 = vld [vmem:[#allocation2 + $0x10] sm:$0xff]  ;;  %v3280_v14 = vld [vmem:[#allocation2 + $0x80] sm:$0xff]  ;;  %v4164_v28 = vsub.s32 0, %v3316_v27  ;;  %v4163_v36 = vsub.s32 1, %v3316_v27 }
  0x21   :  { %282 = vmatpush1.msra.mxu1 %v3268_v4  ;;  %173 = vmatpush1.msra.mxu0 %v46_v10  ;;  %v43_v15 = vld [vmem:[#allocation2 + $0x8] sm:$0xff]  ;;  %v3283_v16 = vld [vmem:[#allocation2 + $0x78] sm:$0xff]  ;;  %v42_v17 = vld [vmem:[#allocation2] sm:$0xff] }
  0x22   :  { %283 = vmatprep.subr.mxu1 %v3271_v6  ;;  %174 = vmatprep.subr.mxu0 %v45_v12  ;;  %v3286_v18 = vld [vmem:[#allocation2 + $0x70] sm:$0xff]  ;;  %v102_v19 = vld [vmem:[%s4157_s0] sm:$0xff]  ;;  %v3292_v20 = vld [vmem:[#allocation2 + $0x68] sm:$0xff] }
  0x23   :  { %284 = vmatpush1.msra.mxu1 %v3274_v9  ;;  %175 = vmatpush1.msra.mxu0 %v44_v13  ;;  %v3295_v21 = vld [vmem:[#allocation2 + $0x60] sm:$0xff]  ;;  %v3299_v22 = vld [vmem:[#allocation2 + $0x58] sm:$0xff]  ;;  %v3302_v23 = vld [vmem:[#allocation2 + $0x50] sm:$0xff] }
  0x24   :  { %285 = vmatprep.subr.mxu1 %v3277_v11  ;;  %176 = vmatprep.subr.mxu0 %v43_v15  ;;  %v3306_v24 = vld [vmem:[#allocation2 + $0x48] sm:$0xff]  ;;  %v3309_v25 = vld [vmem:[#allocation2 + $0x40] sm:$0xff]  ;;  %v3345_v50 = vld [vmem:[#allocation2 + $0x138] sm:$0xff] }
  0x25   :  { %286 = vmatpush1.msra.mxu1 %v3280_v14  ;;  %177 = vmatpush1.msra.mxu0 %v42_v17  ;;  %v67_v29 = vld [vmem:[#allocation2 + $0xc0] ss:$8 sm:$0x3]  ;;  %v104_v51 = vld [vmem:[%s4157_s0 + $0x10] sm:$0xff]  ;;  %v3366_v57 = vld [vmem:[#allocation2 + $0x1b8] sm:$0xff] }
  0x26   :  { %287 = vmatprep.subr.mxu1 %v3283_v16  ;;  %2725 = vmatmul.mubr.msk.f32.vlgmr.msra.gmra.mxu0 %vm121_vm0, %v102_v19  ;;  %v3321_v30 = vrot.slane %v67_v29, %v4164_v28  ;;  %v3327_v37 = vrot.slane %v67_v29, %v4163_v36  ;;  %v103_v47 = vld [vmem:[%s4157_s0 + $0x8] sm:$0xff]  ;;  %v3343_v49 = vld [vmem:[#allocation2 + $0x140] sm:$0xff]  ;;  %v3352_v52 = vld [vmem:[#allocation2 + $0x130] sm:$0xff] }
  0x27   :  { %288 = vmatpush1.msra.mxu1 %v3286_v18  ;;  %216 = vmatprep.mubr.f32.mxu0 %v4161_v0  ;;  %v3341_v48 = vld [vmem:[#allocation2 + $0x148] sm:$0xff]  ;;  %v3360_v55 = vld [vmem:[#allocation2 + $0x1c0] sm:$0xff]  ;;  %v3370_v58 = vld [vmem:[#allocation2 + $0x118] sm:$0xff] }
  0x28   :  { %289 = vmatprep.subr.mxu1 %v3292_v20  ;;  %4200 = vst [vmem:[#allocation8_spill] sm:$0xff] %v3341_v48  ;;  %v3354_v53 = vld [vmem:[#allocation2 + $0x1c8] sm:$0xff]  ;;  %v3364_v56 = vld [vmem:[#allocation2 + $0x120] sm:$0xff]  ;;  %v3372_v59 = vld [vmem:[#allocation2 + $0x1b0] sm:$0xff] }
  0x29   :  { %290 = vmatpush1.msra.mxu1 %v3295_v21  ;;  %461 = vmatprep.subr.mxu0 %v3354_v53  ;;  %v3358_v54 = vld [vmem:[#allocation2 + $0x128] sm:$0xff]  ;;  %v105_v60 = vld [vmem:[%s4157_s0 + $0x18] sm:$0xff]  ;;  %v3379_v61 = vld [vmem:[#allocation2 + $0x110] sm:$0xff] }
  0x2a   :  { %291 = vmatprep.subr.mxu1 %v3299_v22  ;;  %2726 = vmatmul.mubr.msk.f32.gmra.mxu0 %vm121_vm0, %v103_v47  ;;  %v3383_v62 = vld [vmem:[#allocation2 + $0x1a8] sm:$0xff]  ;;  %v3389_v5 = vld [vmem:[#allocation2 + $0x1a0] sm:$0xff]  ;;  %v3395_v8 = vld [vmem:[#allocation2 + $0x198] sm:$0xff] }
  0x2b   :  { %292 = vmatpush1.msra.mxu1 %v3302_v23  ;;  %222 = vmatprep.mubr.f32.mxu0 %v4161_v0  ;;  %v3387_v63 = vld [vmem:[#allocation2 + $0x108] sm:$0xff]  ;;  %v3393_v7 = vld [vmem:[#allocation2 + $0x100] sm:$0xff]  ;;  %v3402_v12 = vld [vmem:[#allocation2 + $0xf8] sm:$0xff] }
  0x2c   :  { %293 = vmatprep.subr.mxu1 %v3306_v24  ;;  %462 = vmatpush1.msra.mxu0 %v3360_v55  ;;  %v106_v10 = vld [vmem:[%s4157_s0 + $0x20] sm:$0xff]  ;;  %v3406_v13 = vld [vmem:[#allocation2 + $0x190] sm:$0xff]  ;;  %v3412_v17 = vld [vmem:[#allocation2 + $0x188] sm:$0xff] }
  0x2d   :  { %294 = vmatpush1.msra.mxu1 %v3309_v25  ;;  %463 = vmatprep.subr.mxu0 %v3366_v57  ;;  %v3410_v15 = vld [vmem:[#allocation2 + $0xf0] sm:$0xff]  ;;  %4201 = vst [vmem:[#allocation9_spill] sm:$0xff] %v3412_v17  ;;  %v3416_v19 = vld [vmem:[#allocation2 + $0xe8] sm:$0xff]  ;;  %v3418_v26 = vld [vmem:[#allocation2 + $0x180] sm:$0xff] }
  0x2e   :  { %328 = vmatmul.mubr.f32.vlgmr.msra.gmra.mxu1 %v4161_v0  ;;  %390 = vmatprep.subr.mxu1 %v3341_v48  ;;  %4202 = vst [vmem:[#allocation10_spill] sm:$0xff] %v3418_v26  ;;  %v107_v29 = vld [vmem:[%s4157_s0 + $0x28] sm:$0xff] }
  0x2f   :  { %438 = vmatprep.mubr.f32.mxu1 %v4161_v0  ;;  %391 = vmatpush1.msra.mxu1 %v3343_v49 }
  0x30   :  { %392 = vmatprep.subr.mxu1 %v3345_v50  ;;  %2727 = vmatmul.mubr.msk.f32.gmra.mxu0 %vm121_vm0, %v104_v51 }
  0x31   :  { %393 = vmatpush1.msra.mxu1 %v3352_v52  ;;  %228 = vmatprep.mubr.f32.mxu0 %v4161_v0 }
  0x32   :  { %394 = vmatprep.subr.mxu1 %v3358_v54  ;;  %464 = vmatpush1.msra.mxu0 %v3372_v59 }
  0x33   :  { %395 = vmatpush1.msra.mxu1 %v3364_v56  ;;  %465 = vmatprep.subr.mxu0 %v3383_v62 }
  0x34   :  { %396 = vmatprep.subr.mxu1 %v3370_v58  ;;  %2728 = vmatmul.mubr.msk.f32.gmra.mxu0 %vm121_vm0, %v105_v60 }
  0x35   :  { %397 = vmatpush1.msra.mxu1 %v3379_v61  ;;  %234 = vmatprep.mubr.f32.mxu0 %v4161_v0 }
  0x36   :  { %398 = vmatprep.subr.mxu1 %v3387_v63  ;;  %466 = vmatpush1.msra.mxu0 %v3389_v5 }
  0x37   :  { %399 = vmatpush1.msra.mxu1 %v3393_v7  ;;  %467 = vmatprep.subr.mxu0 %v3395_v8 }
  0x38   :  { %2729 = vmatmul.mubr.msk.f32.gmra.mxu0 %vm121_vm0, %v106_v10  ;;  %400 = vmatprep.subr.mxu1 %v3402_v12  ;;  %v3468_v10 = vld [vmem:[#allocation2 + $0x158] sm:$0xff] }
  0x39   :  { %240 = vmatprep.mubr.f32.mxu0 %v4161_v0  ;;  %468 = vmatpush1.msra.mxu0 %v3406_v13  ;;  %4207 = vst [vmem:[#allocation15_spill] sm:$0xff] %v3468_v10 }
  0x3a   :  { %401 = vmatpush1.msra.mxu1 %v3410_v15  ;;  %469 = vmatprep.subr.mxu0 %v3412_v17 }
  0x3b   :  { %402 = vmatprep.subr.mxu1 %v3416_v19  ;;  %470 = vmatpush1.msra.mxu0 %v3418_v26 }
  0x3c   :  { %2730 = vmatmul.mubr.msk.f32.gmra.mxu0 %vm121_vm0, %v107_v29  ;;  %v3471_v29 = vld [vmem:[#allocation2 + $0x150] sm:$0xff] }
  0x3d   :  { %246 = vmatprep.mubr.f32.mxu0 %v4161_v0  ;;  %4208 = vst [vmem:[#allocation16_spill] sm:$0xff] %v3471_v29 }
  0xe6   :  { %v212_v31 = vpop.f32.mrf.mxu0 }
  0xe7   :  { %v213_v32 = vadd.f32 %v212_v31, %v3321_v30  ;;  %v3425_v31 = vld [vmem:[#allocation2 + $0xe0] sm:$0xff] }
  0xe8   :  { %v214_v38 = vpop.f32.mrf.mxu0  ;;  %403 = vmatpush1.msra.mxu1 %v3425_v31 }
  0xe9   :  { %v215_v40 = vadd.f32 %v214_v38, %v3327_v37  ;;  %v3441_v38 = vld [vmem:[#allocation2 + $0x168] sm:$0xff] }
  0xea   :  { %4205 = vst [vmem:[#allocation13_spill] sm:$0xff] %v3441_v38 }
  0xee   :  { %v329_v33 = vpop.f32.mrf.mxu1 }
  0xef   :  { %v334_v34 = vadd.f32 %v329_v33, %v213_v32  ;;  %v3429_v32 = vld [vmem:[#allocation2 + $0x178] sm:$0xff] }
  0xf0   :  { %v331_v39 = vpop.f32.mrf.mxu1  ;;  %4203 = vst [vmem:[#allocation11_spill] sm:$0xff] %v3429_v32  ;;  %v3433_v33 = vld [vmem:[#allocation2 + $0xd8] sm:$0xff]  ;;  %471 = vmatprep.subr.mxu0 %v3429_v32 }
  0xf1   :  { %v2733_v35 = vmul.f32 -1.442695, %v334_v34  ;;  %v3330_v41 = vadd.f32 %v331_v39, %v215_v40  ;;  %v3435_v34 = vld [vmem:[#allocation2 + $0x170] sm:$0xff]  ;;  %404 = vmatprep.subr.mxu1 %v3433_v33  ;;  %v3450_v40 = vld [vmem:[#allocation2 + $0x160] sm:$0xff] }
  0xf2   :  { %4204 = vst [vmem:[#allocation12_spill] sm:$0xff] %v3435_v34  ;;  %v108_v39 = vld [vmem:[%s4157_s0 + $0x30] sm:$0xff]  ;;  %472 = vmatpush1.msra.mxu0 %v3435_v34  ;;  %4206 = vst [vmem:[#allocation14_spill] sm:$0xff] %v3450_v40 }
  0xf3   :  { %2932 = vpow2.f32 %v2733_v35  ;;  %v3439_v35 = vld [vmem:[#allocation2 + $0xd0] sm:$0xff]  ;;  %473 = vmatprep.subr.mxu0 %v3441_v38  ;;  %2731 = vmatmul.mubr.msk.f32.gmra.mxu0 %vm121_vm0, %v108_v39 }
  0xf4   :  { %2934 = vtanh.f32 %v3330_v41  ;;  %405 = vmatpush1.msra.mxu1 %v3439_v35  ;;  %252 = vmatprep.mubr.f32.mxu0 %v4161_v0 }
  0xf5   :  { %556 = vmatprep.subr.mxu1 %v3261_v1  ;;  %474 = vmatpush1.msra.mxu0 %v3450_v40 }
  0xf6   :  { %475 = vmatprep.subr.mxu0 %v3468_v10 }
  0xf7   :  { %476 = vmatpush1.msra.mxu0 %v3471_v29 }
  0xf8   :  { %656 = vmatprep.subr.mxu0 %v3341_v48 }
 0x100   :  { %v2933_v42 = vpop.eup %2932 }
 0x101   :  { %v342_v43 = vadd.f32 1.0, %v2933_v42  ;;  %v2935_v44 = vpop.eup %2934  ;;  %v109_v42 = vld [vmem:[%s4157_s0 + $0x38] sm:$0xff] }
 0x102   :  { %2732 = vmatmul.mubr.msk.f32.gmra.mxu0 %vm121_vm0, %v109_v42 }
 0x103   :  { %2936 = vrcp.f32 %v342_v43  ;;  %509 = vmatprep.mubr.f32.mxu0 %v4161_v0  ;;  %v2734_v43 = vmul.f32 -1.442695, %v3330_v41 }
 0x105   :  { %2938 = vpow2.f32 %v2734_v43  ;;  %v218_v43 = vpop.f32.mrf.mxu0 }
 0x106   :  { %510 = vmatmul.mubr.f32.vlgmr.msra.gmra.mxu0 %v4161_v0 }
 0x107   :  { %657 = vmatpush1.msra.mxu0 %v3343_v49  ;;  %704 = vmatprep.mubr.f32.mxu0 %v4161_v0 }
 0x108   :  { %658 = vmatprep.subr.mxu0 %v3345_v50 }
 0x109   :  { %659 = vmatpush1.msra.mxu0 %v3352_v52 }
 0x10a   :  { %660 = vmatprep.subr.mxu0 %v3358_v54 }
 0x10b   :  { %661 = vmatpush1.msra.mxu0 %v3364_v56 }
 0x10c   :  { %662 = vmatprep.subr.mxu0 %v3370_v58 }
 0x10d   :  { %663 = vmatpush1.msra.mxu0 %v3379_v61 }
 0x10e   :  { %664 = vmatprep.subr.mxu0 %v3387_v63 }
 0x10f   :  { %665 = vmatpush1.msra.mxu0 %v3393_v7 }
 0x110   :  { %v3333_v45 = vpop.eup %2936  ;;  %666 = vmatprep.subr.mxu0 %v3402_v12 }
 0x111   :  { %v350_v46 = vmul.f32 %v3333_v45, %v2935_v44  ;;  %v349_v47 = vmul.f32 0.0, %v3333_v45  ;;  %667 = vmatpush1.msra.mxu0 %v3410_v15 }
 0x112   :  { %v2939_v44 = vpop.eup %2938  ;;  %668 = vmatprep.subr.mxu0 %v3416_v19 }
 0x113   :  { %352 = vrot.lane.b32.xlu0 %v350_v46, %s3231_s26  ;;  %v343_v46 = vadd.f32 1.0, %v2939_v44  ;;  %669 = vmatpush1.msra.mxu0 %v3425_v31  ;;  %v220_v44 = vpop.f32.mrf.mxu0 }
 0x114   :  { %670 = vmatprep.subr.mxu0 %v3433_v33 }
 0x115   :  { %2940 = vrcp.f32 %v343_v46  ;;  %671 = vmatpush1.msra.mxu0 %v3439_v35  ;;  %v3530_v46 = vpop.f32.mrf.mxu0 }
 0x116   :  { %827 = vmatprep.subr.mxu0 %v3261_v1  ;;  %4209 = vst [vmem:[#allocation17_spill] sm:$0xff] %v3530_v46  ;;  %v101_v46 = vld [vmem:[#allocation2 + $0x1d0] ss:$8 sm:$0x3] }
 0x122   :  { %v2941_v41 = vpop.eup %2940 }
 0x185   :  { %v353_v51 = vpop.permute.xlu0 %352 }
 0x186   :  { %v3465_v60 = vadd.f32 %v353_v51, %v349_v47  ;;  %v3532_v47 = vpop.f32.mrf.mxu0 }
 0x187   :  { %4210 = vst [vmem:[#allocation18_spill] sm:$0xff] %v3532_v47 }
 0x188   :  { %2942 = vtanh.f32 %v3465_v60  ;;  %v3534_v51 = vpop.f32.mrf.mxu0 }
 0x189   :  { %4211 = vst [vmem:[#allocation19_spill] sm:$0xff] %v3534_v51  ;;  %v4221_v51 = vsub.s32 0, %v3316_v27 }
 0x195   :  { %v2943_v45 = vpop.eup %2942 }
 0x196   :  { %v357_v39 = vmul.f32 %v2943_v45, %v2941_v41  ;;  %v3536_v41 = vpop.f32.mrf.mxu0 }
 0x197   :  { %4212 = vst [vmem:[#allocation20_spill] sm:$0xff] %v3536_v41  ;;  %v3556_v41 = vrot.slane %v101_v46, %v4221_v51 }
 0x198   :  { %370 = vrot.lane.b32.xlu0 %v357_v39, %s3231_s26  ;;  %v3538_v45 = vpop.f32.mrf.mxu0 }
 0x199   :  { %4213 = vst [vmem:[#allocation21_spill] sm:$0xff] %v3538_v45  ;;  %4222 = vst [vmem:[#allocation29_spill] sm:$0xff] %v3556_v41 }
 0x19a   :  { %v3540_v39 = vpop.f32.mrf.mxu0 }
 0x19b   :  { %4214 = vst [vmem:[#allocation22_spill] sm:$0xff] %v3540_v39 }
 0x20a   :  { %v371_v42 = vpop.permute.xlu0 %370 }
 0x20b   :  { %2735 = vmatmul.mubr.msk.f32.vlgmr.msra.gmra.mxu1 %vm259_vm1, %v371_v42 }
 0x20c   :  { %557 = vmatpush1.msra.mxu1 %v3263_v2  ;;  %604 = vmatprep.mubr.f32.mxu1 %v4161_v0 }
 0x20d   :  { %558 = vmatprep.subr.mxu1 %v3265_v3 }
 0x20e   :  { %559 = vmatpush1.msra.mxu1 %v3268_v4 }
 0x20f   :  { %560 = vmatprep.subr.mxu1 %v3271_v6 }
 0x210   :  { %561 = vmatpush1.msra.mxu1 %v3274_v9 }
 0x211   :  { %562 = vmatprep.subr.mxu1 %v3277_v11 }
 0x212   :  { %563 = vmatpush1.msra.mxu1 %v3280_v14 }
 0x213   :  { %564 = vmatprep.subr.mxu1 %v3283_v16 }
 0x214   :  { %565 = vmatpush1.msra.mxu1 %v3286_v18 }
 0x215   :  { %566 = vmatprep.subr.mxu1 %v3292_v20 }
 0x216   :  { %567 = vmatpush1.msra.mxu1 %v3295_v21 }
 0x217   :  { %568 = vmatprep.subr.mxu1 %v3299_v22 }
 0x218   :  { %569 = vmatpush1.msra.mxu1 %v3302_v23 }
 0x219   :  { %570 = vmatprep.subr.mxu1 %v3306_v24 }
 0x21a   :  { %571 = vmatpush1.msra.mxu1 %v3309_v25 }
 0x21b   :  { %2738 = vmatmul.mubr.msk.f32.vlgmr.msra.gmra.mxu1 %vm259_vm1, %v371_v42  ;;  %732 = vmatprep.subr.mxu1 %v3354_v53  ;;  %v3542_v42 = vpop.f32.mrf.mxu0 }
 0x21c   :  { %733 = vmatpush1.msra.mxu1 %v3360_v55  ;;  %780 = vmatprep.mubr.f32.mxu1 %v4161_v0  ;;  %4215 = vst [vmem:[#allocation23_spill] sm:$0xff] %v3542_v42 }
 0x21d   :  { %734 = vmatprep.subr.mxu1 %v3366_v57  ;;  %v3544_v0 = vpop.f32.mrf.mxu0 }
 0x21e   :  { %735 = vmatpush1.msra.mxu1 %v3372_v59  ;;  %4216 = vst [vmem:[#allocation24_spill] sm:$0xff] %v3544_v0 }
 0x21f   :  { %736 = vmatprep.subr.mxu1 %v3383_v62  ;;  %v3546_v36 = vpop.f32.mrf.mxu0 }
 0x220   :  { %737 = vmatpush1.msra.mxu1 %v3389_v5  ;;  %4217 = vst [vmem:[#allocation25_spill] sm:$0xff] %v3546_v36  ;;  %v4223_v36 = vsub.s32 1, %v3316_v27  ;;  %v221_v27 = vadd.f32 %v220_v44, %v3327_v37 }
 0x221   :  { %738 = vmatprep.subr.mxu1 %v3395_v8  ;;  %v3548_v28 = vpop.f32.mrf.mxu0 }
 0x222   :  { %739 = vmatpush1.msra.mxu1 %v3406_v13  ;;  %4218 = vst [vmem:[#allocation26_spill] sm:$0xff] %v3548_v28  ;;  %v3561_v0 = vrot.slane %v101_v46, %v4223_v36 }
 0x223   :  { %740 = vmatprep.subr.mxu1 %v3412_v17 }
 0x224   :  { %741 = vmatpush1.msra.mxu1 %v3418_v26  ;;  %4224 = vst [vmem:[#allocation30_spill] sm:$0xff] %v3561_v0 }
 0x225   :  { %742 = vmatprep.subr.mxu1 %v3429_v32 }
 0x226   :  { %743 = vmatpush1.msra.mxu1 %v3435_v34 }
 0x227   :  { %744 = vmatprep.subr.mxu1 %v3441_v38 }
 0x228   :  { %745 = vmatpush1.msra.mxu1 %v3450_v40 }
 0x229   :  { %746 = vmatprep.subr.mxu1 %v3468_v10 }
 0x22a   :  { %747 = vmatpush1.msra.mxu1 %v3471_v29 }
 0x22b   :  { %927 = vmatprep.subr.mxu1 %v3341_v48  ;;  %v3550_v48 = vpop.f32.mrf.mxu0 }
 0x22c   :  { %4219 = vst [vmem:[#allocation27_spill] sm:$0xff] %v3550_v48  ;;  %v219_v48 = vadd.f32 %v218_v43, %v3321_v30 }
 0x22d   :  { %v3552_v47 = vpop.f32.mrf.mxu0 }
 0x22e   :  { %4220 = vst [vmem:[#allocation28_spill] sm:$0xff] %v3552_v47 }
 0x22f   :  { %v511_v29 = vpop.f32.mrf.mxu0 }
 0x231   :  { %v513_v40 = vpop.f32.mrf.mxu0 }
 0x2cb   :  { %v440_v45 = vpop.f32.mrf.mxu1 }
 0x2cc   :  { %v441_v39 = vadd.f32 %v440_v45, %v3556_v41 }
 0x2cd   :  { %v442_v28 = vpop.f32.mrf.mxu1 }
 0x2ce   :  { %v516_v42 = vadd.f32 %v511_v29, %v441_v39  ;;  %v443_v47 = vadd.f32 %v442_v28, %v3561_v0 }
 0x2d0   :  { %v2736_v10 = vmul.f32 -1.442695, %v516_v42  ;;  %v517_v34 = vadd.f32 %v513_v40, %v443_v47 }
 0x2d2   :  { %2944 = vpow2.f32 %v2736_v10 }
 0x2db   :  { %v606_v38 = vpop.f32.mrf.mxu1 }
 0x2dc   :  { %v611_v51 = vadd.f32 %v606_v38, %v219_v48 }
 0x2dd   :  { %v608_v10 = vpop.f32.mrf.mxu1 }
 0x2de   :  { %v2739_v32 = vmul.f32 -1.442695, %v611_v51  ;;  %v612_v36 = vadd.f32 %v608_v10, %v221_v27 }
 0x2df   :  { %v2945_v26 = vpop.eup %2944 }
 0x2e0   :  { %v524_v17 = vadd.f32 1.0, %v2945_v26  ;;  %2946 = vpow2.f32 %v2739_v32  ;;  %v2740_v26 = vmul.f32 -1.442695, %v612_v36 }
 0x2e1   :  { %2948 = vtanh.f32 %v517_v34 }
 0x2e2   :  { %2950 = vrcp.f32 %v524_v17  ;;  %v2737_v17 = vmul.f32 -1.442695, %v517_v34 }
 0x2e3   :  { %2952 = vtanh.f32 %v612_v36 }
 0x2ed   :  { %v2947_v29 = vpop.eup %2946 }
 0x2ee   :  { %v2949_v46 = vpop.eup %2948  ;;  %v619_v45 = vadd.f32 1.0, %v2947_v29 }
 0x2ef   :  { %v2951_v43 = vpop.eup %2950 }
 0x2f0   :  { %2954 = vrcp.f32 %v619_v45  ;;  %v532_v28 = vmul.f32 %v2951_v43, %v2949_v46  ;;  %v2953_v48 = vpop.eup %2952  ;;  %v531_v39 = vmul.f32 0.0, %v2951_v43 }
 0x2f1   :  { %2956 = vpow2.f32 %v2740_v26  ;;  %v4226_v26 = vld [vmem:[#allocation9_spill] sm:$0xff] }
 0x2f2   :  { %534 = vrot.lane.b32.xlu0 %v532_v28, %s3231_s26  ;;  %2958 = vpow2.f32 %v2737_v17  ;;  %v4227_v17 = vld [vmem:[#allocation10_spill] sm:$0xff] }
 0x2fd   :  { %v2955_v38 = vpop.eup %2954 }
 0x2fe   :  { %v627_v40 = vmul.f32 %v2955_v38, %v2953_v48  ;;  %v2957_v32 = vpop.eup %2956  ;;  %v626_v42 = vmul.f32 %v2955_v38, %v3465_v60  ;;  %v4225_v38 = vmov 0.0  }
 0x2ff   :  { %v620_v44 = vadd.f32 1.0, %v2957_v32  ;;  %v2959_v51 = vpop.eup %2958  ;;  %v4228_v32 = vld [vmem:[#allocation11_spill] sm:$0xff] }
 0x300   :  { %629 = vrot.lane.b32.xlu1 %v627_v40, %s3231_s26  ;;  %v525_v46 = vadd.f32 1.0, %v2959_v51  ;;  %v4233_v51 = vld [vmem:[#allocation16_spill] sm:$0xff] }
 0x301   :  { %2960 = vrcp.f32 %v620_v44  ;;  %v4229_v44 = vld [vmem:[#allocation12_spill] sm:$0xff] }
 0x30e   :  { %v2961_v34 = vpop.eup %2960 }
 0x364   :  { %v535_v47 = vpop.permute.xlu0 %534 }
 0x365   :  { %v3569_v27 = vadd.f32 %v535_v47, %v531_v39  ;;  %v4230_v47 = vld [vmem:[#allocation13_spill] sm:$0xff]  ;;  %v4231_v39 = vld [vmem:[#allocation14_spill] sm:$0xff] }
 0x372   :  { %v630_v10 = vpop.permute.xlu1 %629 }
 0x373   :  { %v3571_v29 = vadd.f32 %v630_v10, %v626_v42  ;;  %v4232_v42 = vld [vmem:[#allocation15_spill] sm:$0xff]  ;;  %v4234_v10 = vld [vmem:[#allocation8_spill] sm:$0xff] }
 0x375   :  { %2962 = vtanh.f32 %v3571_v29 }
 0x376   :  { %2964 = vtanh.f32 %v3569_v27 }
 0x377   :  { %2966 = vrcp.f32 %v525_v46 }
 0x382   :  { %v2963_v36 = vpop.eup %2962 }
 0x383   :  { %v634_v45 = vmul.f32 %v2963_v36, %v2961_v34  ;;  %v2965_v28 = vpop.eup %2964 }
 0x384   :  { %v2967_v60 = vpop.eup %2966 }
 0x385   :  { %636 = vrot.lane.b32.xlu1 %v634_v45, %s3231_s26  ;;  %v539_v43 = vmul.f32 %v2967_v60, %v2965_v28  ;;  %v4235_v60 = vld [vmem:[#allocation17_spill] sm:$0xff] }
 0x389   :  { %712 = vrot.lane.b32.xlu1 %v539_v43, %s3231_s26  ;;  %v225_v43 = vadd.f32 %v4235_v60, %v3321_v30 }
 0x3f7   :  { %v637_v48 = vpop.permute.xlu1 %636 }
 0x3f8   :  { %2741 = vmatmul.mubr.msk.f32.vlgmr.msra.gmra.mxu0 %vm259_vm1, %v637_v48 }
 0x3f9   :  { %828 = vmatpush1.msra.mxu0 %v3263_v2  ;;  %875 = vmatprep.mubr.f32.mxu0 %v4225_v38 }
 0x3fa   :  { %829 = vmatprep.subr.mxu0 %v3265_v3 }
 0x3fb   :  { %830 = vmatpush1.msra.mxu0 %v3268_v4  ;;  %v713_v40 = vpop.permute.xlu1 %712 }
 0x3fc   :  { %831 = vmatprep.subr.mxu0 %v3271_v6  ;;  %2742 = vmatmul.mubr.msk.f32.vlgmr.msra.gmra.mxu1 %vm259_vm1, %v713_v40 }
 0x3fd   :  { %832 = vmatpush1.msra.mxu0 %v3274_v9  ;;  %928 = vmatpush1.msra.mxu1 %v3343_v49 }
 0x3fe   :  { %833 = vmatprep.subr.mxu0 %v3277_v11  ;;  %929 = vmatprep.subr.mxu1 %v3345_v50 }
 0x3ff   :  { %834 = vmatpush1.msra.mxu0 %v3280_v14  ;;  %930 = vmatpush1.msra.mxu1 %v3352_v52 }
 0x400   :  { %835 = vmatprep.subr.mxu0 %v3283_v16  ;;  %931 = vmatprep.subr.mxu1 %v3358_v54 }
 0x401   :  { %836 = vmatpush1.msra.mxu0 %v3286_v18  ;;  %932 = vmatpush1.msra.mxu1 %v3364_v56 }
 0x402   :  { %837 = vmatprep.subr.mxu0 %v3292_v20  ;;  %933 = vmatprep.subr.mxu1 %v3370_v58 }
 0x403   :  { %838 = vmatpush1.msra.mxu0 %v3295_v21  ;;  %934 = vmatpush1.msra.mxu1 %v3379_v61 }
 0x404   :  { %839 = vmatprep.subr.mxu0 %v3299_v22  ;;  %935 = vmatprep.subr.mxu1 %v3387_v63 }
 0x405   :  { %840 = vmatpush1.msra.mxu0 %v3302_v23  ;;  %936 = vmatpush1.msra.mxu1 %v3393_v7 }
 0x406   :  { %841 = vmatprep.subr.mxu0 %v3306_v24  ;;  %937 = vmatprep.subr.mxu1 %v3402_v12 }
 0x407   :  { %842 = vmatpush1.msra.mxu0 %v3309_v25  ;;  %938 = vmatpush1.msra.mxu1 %v3410_v15 }
 0x408   :  { %2745 = vmatmul.mubr.msk.f32.vlgmr.msra.gmra.mxu0 %vm259_vm1, %v637_v48  ;;  %1003 = vmatprep.subr.mxu0 %v3354_v53 }
 0x409   :  { %1004 = vmatpush1.msra.mxu0 %v3360_v55  ;;  %939 = vmatprep.subr.mxu1 %v3416_v19 }
 0x40a   :  { %1005 = vmatprep.subr.mxu0 %v3366_v57  ;;  %940 = vmatpush1.msra.mxu1 %v3425_v31 }
 0x40b   :  { %1006 = vmatpush1.msra.mxu0 %v3372_v59  ;;  %941 = vmatprep.subr.mxu1 %v3433_v33 }
 0x40c   :  { %1007 = vmatprep.subr.mxu0 %v3383_v62  ;;  %942 = vmatpush1.msra.mxu1 %v3439_v35 }
 0x40d   :  { %1008 = vmatpush1.msra.mxu0 %v3389_v5  ;;  %975 = vmatprep.mubr.f32.mxu1 %v4225_v38 }
 0x40e   :  { %1009 = vmatprep.subr.mxu0 %v3395_v8  ;;  %1098 = vmatprep.subr.mxu1 %v3261_v1 }
 0x40f   :  { %1010 = vmatpush1.msra.mxu0 %v3406_v13  ;;  %1051 = vmatprep.mubr.f32.mxu0 %v4225_v38 }
 0x410   :  { %1011 = vmatprep.subr.mxu0 %v4226_v26 }
 0x411   :  { %1012 = vmatpush1.msra.mxu0 %v4227_v17 }
 0x412   :  { %1013 = vmatprep.subr.mxu0 %v4228_v32 }
 0x413   :  { %1014 = vmatpush1.msra.mxu0 %v4229_v44 }
 0x414   :  { %1015 = vmatprep.subr.mxu0 %v4230_v47 }
 0x415   :  { %1016 = vmatpush1.msra.mxu0 %v4231_v39 }
 0x416   :  { %1017 = vmatprep.subr.mxu0 %v4232_v42 }
 0x417   :  { %1018 = vmatpush1.msra.mxu0 %v4233_v51  ;;  %v4236_v51 = vld [vmem:[#allocation18_spill] sm:$0xff] }
 0x418   :  { %1198 = vmatprep.subr.mxu0 %v4234_v10  ;;  %v227_v44 = vadd.f32 %v4236_v51, %v3327_v37 }
 0x4b8   :  { %v706_v46 = vpop.f32.mrf.mxu0 }
 0x4b9   :  { %v707_v36 = vadd.f32 %v706_v46, %v3556_v41 }
 0x4ba   :  { %v708_v28 = vpop.f32.mrf.mxu0 }
 0x4bb   :  { %v709_v46 = vadd.f32 %v708_v28, %v3561_v0 }
 0x4bc   :  { %v782_v34 = vpop.f32.mrf.mxu1 }
 0x4bd   :  { %v787_v45 = vadd.f32 %v782_v34, %v707_v36 }
 0x4be   :  { %v784_v26 = vpop.f32.mrf.mxu1 }
 0x4bf   :  { %v2743_v48 = vmul.f32 -1.442695, %v787_v45  ;;  %v788_v60 = vadd.f32 %v784_v26, %v709_v46 }
 0x4c1   :  { %2968 = vpow2.f32 %v2743_v48 }
 0x4c8   :  { %v877_v40 = vpop.f32.mrf.mxu0 }
 0x4c9   :  { %v882_v47 = vadd.f32 %v877_v40, %v225_v43 }
 0x4ca   :  { %v879_v42 = vpop.f32.mrf.mxu0 }
 0x4cb   :  { %v2746_v39 = vmul.f32 -1.442695, %v882_v47  ;;  %v883_v32 = vadd.f32 %v879_v42, %v227_v44  ;;  %v2744_v42 = vmul.f32 -1.442695, %v788_v60 }
 0x4cd   :  { %2970 = vpow2.f32 %v2746_v39  ;;  %v2747_v44 = vmul.f32 -1.442695, %v883_v32 }
 0x4ce   :  { %v2969_v10 = vpop.eup %2968  ;;  %2972 = vtanh.f32 %v883_v32 }
 0x4cf   :  { %v795_v34 = vadd.f32 1.0, %v2969_v10 }
 0x4da   :  { %v2971_v17 = vpop.eup %2970 }
 0x4db   :  { %v890_v36 = vadd.f32 1.0, %v2971_v17  ;;  %v2973_v45 = vpop.eup %2972 }
 0x4dd   :  { %2974 = vrcp.f32 %v890_v36 }
 0x4de   :  { %2976 = vrcp.f32 %v795_v34 }
 0x4df   :  { %2978 = vtanh.f32 %v788_v60 }
 0x4e0   :  { %2980 = vpow2.f32 %v2747_v44 }
 0x4e1   :  { %2982 = vpow2.f32 %v2744_v42 }
 0x4ea   :  { %v2975_v47 = vpop.eup %2974 }
 0x4eb   :  { %v898_v39 = vmul.f32 %v2975_v47, %v2973_v45  ;;  %v2977_v43 = vpop.eup %2976  ;;  %v897_v28 = vmul.f32 %v2975_v47, %v3571_v29 }
 0x4ec   :  { %v2979_v51 = vpop.eup %2978  ;;  %v802_v36 = vmul.f32 %v2977_v43, %v3569_v27 }
 0x4ed   :  { %900 = vrot.lane.b32.xlu0 %v898_v39, %s3231_s26  ;;  %v803_v48 = vmul.f32 %v2979_v51, %v2977_v43  ;;  %v2981_v17 = vpop.eup %2980 }
 0x4ee   :  { %v891_v10 = vadd.f32 1.0, %v2981_v17  ;;  %v2983_v26 = vpop.eup %2982 }
 0x4ef   :  { %v796_v34 = vadd.f32 1.0, %v2983_v26 }
 0x4f0   :  { %2984 = vrcp.f32 %v891_v10 }
 0x4f1   :  { %805 = vrot.lane.b32.xlu0 %v803_v48, %s3231_s26 }
 0x4fd   :  { %v2985_v32 = vpop.eup %2984 }
 0x55f   :  { %v901_v40 = vpop.permute.xlu0 %900 }
 0x560   :  { %v3640_v46 = vadd.f32 %v901_v40, %v897_v28 }
 0x562   :  { %2986 = vtanh.f32 %v3640_v46 }
 0x563   :  { %v806_v45 = vpop.permute.xlu0 %805  ;;  %2988 = vrcp.f32 %v796_v34 }
 0x564   :  { %v3644_v39 = vadd.f32 %v806_v45, %v802_v36 }
 0x566   :  { %2990 = vtanh.f32 %v3644_v39 }
 0x56f   :  { %v2987_v60 = vpop.eup %2986 }
 0x570   :  { %v905_v51 = vmul.f32 %v2987_v60, %v2985_v32  ;;  %v2989_v48 = vpop.eup %2988  ;;  %v4247_v32 = vld [vmem:[#allocation20_spill] sm:$0xff] }
 0x571   :  { %v233_v60 = vadd.f32 %v4247_v32, %v3327_v37 }
 0x572   :  { %907 = vrot.lane.b32.xlu1 %v905_v51, %s3231_s26 }
 0x573   :  { %v2991_v29 = vpop.eup %2990 }
 0x574   :  { %v810_v47 = vmul.f32 %v2991_v29, %v2989_v48 }
 0x576   :  { %983 = vrot.lane.b32.xlu1 %v810_v47, %s3231_s26 }
 0x5e4   :  { %v908_v44 = vpop.permute.xlu1 %907 }
 0x5e5   :  { %2748 = vmatmul.mubr.msk.f32.vlgmr.msra.gmra.mxu1 %vm259_vm1, %v908_v44 }
 0x5e6   :  { %1099 = vmatpush1.msra.mxu1 %v3263_v2  ;;  %1146 = vmatprep.mubr.f32.mxu1 %v4225_v38  ;;  %v4237_v2 = vld [vmem:[#allocation9_spill] sm:$0xff] }
 0x5e7   :  { %1100 = vmatprep.subr.mxu1 %v3265_v3  ;;  %v4238_v3 = vld [vmem:[#allocation10_spill] sm:$0xff] }
 0x5e8   :  { %1101 = vmatpush1.msra.mxu1 %v3268_v4  ;;  %v984_v27 = vpop.permute.xlu1 %983  ;;  %v4239_v4 = vld [vmem:[#allocation11_spill] sm:$0xff] }
 0x5e9   :  { %1102 = vmatprep.subr.mxu1 %v3271_v6  ;;  %2749 = vmatmul.mubr.msk.f32.vlgmr.msra.gmra.mxu0 %vm259_vm1, %v984_v27  ;;  %v4240_v6 = vld [vmem:[#allocation12_spill] sm:$0xff] }
 0x5ea   :  { %1103 = vmatpush1.msra.mxu1 %v3274_v9  ;;  %1199 = vmatpush1.msra.mxu0 %v3343_v49  ;;  %v4241_v9 = vld [vmem:[#allocation13_spill] sm:$0xff] }
 0x5eb   :  { %1104 = vmatprep.subr.mxu1 %v3277_v11  ;;  %1200 = vmatprep.subr.mxu0 %v3345_v50  ;;  %v4242_v11 = vld [vmem:[#allocation14_spill] sm:$0xff] }
 0x5ec   :  { %1105 = vmatpush1.msra.mxu1 %v3280_v14  ;;  %1201 = vmatpush1.msra.mxu0 %v3352_v52  ;;  %v4243_v14 = vld [vmem:[#allocation15_spill] sm:$0xff] }
 0x5ed   :  { %1106 = vmatprep.subr.mxu1 %v3283_v16  ;;  %1202 = vmatprep.subr.mxu0 %v3358_v54  ;;  %v4244_v16 = vld [vmem:[#allocation16_spill] sm:$0xff] }
 0x5ee   :  { %1107 = vmatpush1.msra.mxu1 %v3286_v18  ;;  %1203 = vmatpush1.msra.mxu0 %v3364_v56  ;;  %v4245_v18 = vld [vmem:[#allocation8_spill] sm:$0xff] }
 0x5ef   :  { %1108 = vmatprep.subr.mxu1 %v3292_v20  ;;  %1204 = vmatprep.subr.mxu0 %v3370_v58 }
 0x5f0   :  { %1109 = vmatpush1.msra.mxu1 %v3295_v21  ;;  %1205 = vmatpush1.msra.mxu0 %v3379_v61 }
 0x5f1   :  { %1110 = vmatprep.subr.mxu1 %v3299_v22  ;;  %1206 = vmatprep.subr.mxu0 %v3387_v63 }
 0x5f2   :  { %1111 = vmatpush1.msra.mxu1 %v3302_v23  ;;  %1207 = vmatpush1.msra.mxu0 %v3393_v7 }
 0x5f3   :  { %1112 = vmatprep.subr.mxu1 %v3306_v24  ;;  %1208 = vmatprep.subr.mxu0 %v3402_v12 }
 0x5f4   :  { %1113 = vmatpush1.msra.mxu1 %v3309_v25  ;;  %1209 = vmatpush1.msra.mxu0 %v3410_v15  ;;  %v4246_v25 = vld [vmem:[#allocation19_spill] sm:$0xff] }
 0x5f5   :  { %2752 = vmatmul.mubr.msk.f32.vlgmr.msra.gmra.mxu1 %vm259_vm1, %v908_v44  ;;  %1274 = vmatprep.subr.mxu1 %v3354_v53  ;;  %v231_v43 = vadd.f32 %v4246_v25, %v3321_v30 }
 0x5f6   :  { %1275 = vmatpush1.msra.mxu1 %v3360_v55  ;;  %1322 = vmatprep.mubr.f32.mxu1 %v4225_v38 }
 0x5f7   :  { %1276 = vmatprep.subr.mxu1 %v3366_v57  ;;  %1210 = vmatprep.subr.mxu0 %v3416_v19 }
 0x5f8   :  { %1277 = vmatpush1.msra.mxu1 %v3372_v59  ;;  %1211 = vmatpush1.msra.mxu0 %v3425_v31 }
 0x5f9   :  { %1278 = vmatprep.subr.mxu1 %v3383_v62  ;;  %1212 = vmatprep.subr.mxu0 %v3433_v33 }
 0x5fa   :  { %1279 = vmatpush1.msra.mxu1 %v3389_v5  ;;  %1213 = vmatpush1.msra.mxu0 %v3439_v35 }
 0x5fb   :  { %1280 = vmatprep.subr.mxu1 %v3395_v8  ;;  %1246 = vmatprep.mubr.f32.mxu0 %v4225_v38 }
 0x5fc   :  { %1281 = vmatpush1.msra.mxu1 %v3406_v13  ;;  %1369 = vmatprep.subr.mxu0 %v3261_v1 }
 0x5fd   :  { %1282 = vmatprep.subr.mxu1 %v4237_v2 }
 0x5fe   :  { %1283 = vmatpush1.msra.mxu1 %v4238_v3 }
 0x5ff   :  { %1284 = vmatprep.subr.mxu1 %v4239_v4 }
 0x600   :  { %1285 = vmatpush1.msra.mxu1 %v4240_v6 }
 0x601   :  { %1286 = vmatprep.subr.mxu1 %v4241_v9 }
 0x602   :  { %1287 = vmatpush1.msra.mxu1 %v4242_v11 }
 0x603   :  { %1288 = vmatprep.subr.mxu1 %v4243_v14 }
 0x604   :  { %1289 = vmatpush1.msra.mxu1 %v4244_v16 }
 0x605   :  { %1469 = vmatprep.subr.mxu1 %v4245_v18 }
 0x6a5   :  { %v977_v20 = vpop.f32.mrf.mxu1 }
 0x6a6   :  { %v978_v1 = vadd.f32 %v977_v20, %v3556_v41 }
 0x6a7   :  { %v979_v24 = vpop.f32.mrf.mxu1 }
 0x6a8   :  { %v980_v26 = vadd.f32 %v979_v24, %v3561_v0 }
 0x6a9   :  { %v1053_v21 = vpop.f32.mrf.mxu0 }
 0x6aa   :  { %v1058_v22 = vadd.f32 %v1053_v21, %v978_v1 }
 0x6ab   :  { %v1055_v17 = vpop.f32.mrf.mxu0 }
 0x6ac   :  { %v2750_v23 = vmul.f32 -1.442695, %v1058_v22  ;;  %v1059_v40 = vadd.f32 %v1055_v17, %v980_v26 }
 0x6ae   :  { %2992 = vpow2.f32 %v2750_v23  ;;  %v2751_v21 = vmul.f32 -1.442695, %v1059_v40 }
 0x6b5   :  { %v1148_v42 = vpop.f32.mrf.mxu1 }
 0x6b6   :  { %v1153_v10 = vadd.f32 %v1148_v42, %v231_v43 }
 0x6b7   :  { %v1150_v45 = vpop.f32.mrf.mxu1 }
 0x6b8   :  { %v2753_v28 = vmul.f32 -1.442695, %v1153_v10  ;;  %v1154_v51 = vadd.f32 %v1150_v45, %v233_v60 }
 0x6ba   :  { %2994 = vpow2.f32 %v2753_v28  ;;  %v2754_v22 = vmul.f32 -1.442695, %v1154_v51 }
 0x6bb   :  { %v2993_v34 = vpop.eup %2992  ;;  %2996 = vtanh.f32 %v1059_v40 }
 0x6bc   :  { %v1066_v36 = vadd.f32 1.0, %v2993_v34 }
 0x6be   :  { %2998 = vrcp.f32 %v1066_v36 }
 0x6bf   :  { %3000 = vtanh.f32 %v1154_v51 }
 0x6c7   :  { %v2995_v48 = vpop.eup %2994 }
 0x6c8   :  { %v1161_v29 = vadd.f32 1.0, %v2995_v48  ;;  %v2997_v47 = vpop.eup %2996  ;;  %v3785_v48 = vld [vmem:[#allocation2 + $0x40] sm:$0xff] }
 0x6ca   :  { %3002 = vrcp.f32 %v1161_v29 }
 0x6cb   :  { %v2999_v44 = vpop.eup %2998  ;;  %3004 = vpow2.f32 %v2751_v21 }
 0x6cc   :  { %v1074_v27 = vmul.f32 %v2999_v44, %v2997_v47  ;;  %v3001_v18 = vpop.eup %3000  ;;  %3006 = vpow2.f32 %v2754_v22  ;;  %v1073_v25 = vmul.f32 %v2999_v44, %v3644_v39  ;;  %v4250_v44 = vld [vmem:[#allocation22_spill] sm:$0xff] }
 0x6ce   :  { %1076 = vrot.lane.b32.xlu1 %v1074_v27, %s3231_s26  ;;  %v239_v27 = vadd.f32 %v4250_v44, %v3327_v37 }
 0x6d7   :  { %v3003_v20 = vpop.eup %3002 }
 0x6d8   :  { %v1169_v1 = vmul.f32 %v3003_v20, %v3001_v18  ;;  %v3005_v23 = vpop.eup %3004  ;;  %v1168_v26 = vmul.f32 %v3003_v20, %v3640_v46  ;;  %v3782_v46 = vld [vmem:[#allocation2 + $0x48] sm:$0xff] }
 0x6d9   :  { %v1067_v24 = vadd.f32 1.0, %v3005_v23  ;;  %v3007_v17 = vpop.eup %3006 }
 0x6da   :  { %1171 = vrot.lane.b32.xlu0 %v1169_v1, %s3231_s26  ;;  %v1162_v10 = vadd.f32 1.0, %v3007_v17 }
 0x6db   :  { %3008 = vrcp.f32 %v1067_v24 }
 0x6e8   :  { %v3009_v40 = vpop.eup %3008 }
 0x740   :  { %v1077_v43 = vpop.permute.xlu1 %1076 }
 0x741   :  { %v3712_v42 = vadd.f32 %v1077_v43, %v1073_v25 }
 0x743   :  { %3010 = vtanh.f32 %v3712_v42 }
 0x744   :  { %3012 = vrcp.f32 %v1162_v10 }
 0x74c   :  { %v1172_v28 = vpop.permute.xlu0 %1171 }
 0x74d   :  { %v3716_v34 = vadd.f32 %v1172_v28, %v1168_v26 }
 0x74f   :  { %3014 = vtanh.f32 %v3716_v34 }
 0x750   :  { %v3011_v36 = vpop.eup %3010 }
 0x751   :  { %v1081_v45 = vmul.f32 %v3011_v36, %v3009_v40  ;;  %v3013_v39 = vpop.eup %3012 }
 0x753   :  { %1254 = vrot.lane.b32.xlu1 %v1081_v45, %s3231_s26 }
 0x75c   :  { %v3015_v32 = vpop.eup %3014 }
 0x75d   :  { %v1176_v60 = vmul.f32 %v3015_v32, %v3013_v39 }
 0x75f   :  { %1178 = vrot.lane.b32.xlu0 %v1176_v60, %s3231_s26 }
 0x7c5   :  { %v1255_v51 = vpop.permute.xlu1 %1254 }
 0x7c6   :  { %2756 = vmatmul.mubr.msk.f32.vlgmr.msra.gmra.mxu1 %vm259_vm1, %v1255_v51 }
 0x7c7   :  { %1470 = vmatpush1.msra.mxu1 %v3343_v49  ;;  %1517 = vmatprep.mubr.f32.mxu1 %v4225_v38 }
 0x7c8   :  { %1471 = vmatprep.subr.mxu1 %v3345_v50  ;;  %v3736_v50 = vld [vmem:[#allocation2 + $0xb0] sm:$0xff] }
 0x7c9   :  { %1472 = vmatpush1.msra.mxu1 %v3352_v52  ;;  %v3740_v52 = vld [vmem:[#allocation2 + $0xa8] sm:$0xff] }
 0x7ca   :  { %1473 = vmatprep.subr.mxu1 %v3358_v54  ;;  %v3744_v54 = vld [vmem:[#allocation2 + $0xa0] sm:$0xff] }
 0x7cb   :  { %1474 = vmatpush1.msra.mxu1 %v3364_v56  ;;  %v3748_v56 = vld [vmem:[#allocation2 + $0x98] sm:$0xff] }
 0x7cc   :  { %1475 = vmatprep.subr.mxu1 %v3370_v58  ;;  %v3752_v58 = vld [vmem:[#allocation2 + $0x90] sm:$0xff] }
 0x7cd   :  { %1476 = vmatpush1.msra.mxu1 %v3379_v61  ;;  %v3755_v61 = vld [vmem:[#allocation2 + $0xb8] sm:$0xff] }
 0x7ce   :  { %1477 = vmatprep.subr.mxu1 %v3387_v63  ;;  %v3758_v63 = vld [vmem:[#allocation2 + $0x88] sm:$0xff] }
 0x7cf   :  { %1478 = vmatpush1.msra.mxu1 %v3393_v7  ;;  %v3761_v7 = vld [vmem:[#allocation2 + $0x80] sm:$0xff] }
 0x7d0   :  { %1479 = vmatprep.subr.mxu1 %v3402_v12  ;;  %v3764_v12 = vld [vmem:[#allocation2 + $0x78] sm:$0xff] }
 0x7d1   :  { %v1179_v49 = vpop.permute.xlu0 %1178  ;;  %1480 = vmatpush1.msra.mxu1 %v3410_v15  ;;  %v3767_v15 = vld [vmem:[#allocation2 + $0x70] sm:$0xff] }
 0x7d2   :  { %2755 = vmatmul.mubr.msk.f32.vlgmr.msra.gmra.mxu0 %vm259_vm1, %v1179_v49  ;;  %1481 = vmatprep.subr.mxu1 %v3416_v19  ;;  %v3770_v19 = vld [vmem:[#allocation2 + $0x68] sm:$0xff] }
 0x7d3   :  { %1370 = vmatpush1.msra.mxu0 %v3736_v50  ;;  %1417 = vmatprep.mubr.f32.mxu0 %v4225_v38 }
 0x7d4   :  { %1371 = vmatprep.subr.mxu0 %v3740_v52  ;;  %1482 = vmatpush1.msra.mxu1 %v3425_v31  ;;  %v3773_v31 = vld [vmem:[#allocation2 + $0x60] sm:$0xff] }
 0x7d5   :  { %1372 = vmatpush1.msra.mxu0 %v3744_v54  ;;  %1483 = vmatprep.subr.mxu1 %v3433_v33  ;;  %v3776_v33 = vld [vmem:[#allocation2 + $0x58] sm:$0xff] }
 0x7d6   :  { %1373 = vmatprep.subr.mxu0 %v3748_v56  ;;  %1484 = vmatpush1.msra.mxu1 %v3439_v35  ;;  %v3779_v35 = vld [vmem:[#allocation2 + $0x50] sm:$0xff] }
 0x7d7   :  { %1374 = vmatpush1.msra.mxu0 %v3752_v58  ;;  %1640 = vmatprep.subr.mxu1 %v3755_v61 }
 0x7d8   :  { %1375 = vmatprep.subr.mxu0 %v3758_v63 }
 0x7d9   :  { %1376 = vmatpush1.msra.mxu0 %v3761_v7 }
 0x7da   :  { %1377 = vmatprep.subr.mxu0 %v3764_v12 }
 0x7db   :  { %1378 = vmatpush1.msra.mxu0 %v3767_v15 }
 0x7dc   :  { %1379 = vmatprep.subr.mxu0 %v3770_v19 }
 0x7dd   :  { %1380 = vmatpush1.msra.mxu0 %v3773_v31 }
 0x7de   :  { %1381 = vmatprep.subr.mxu0 %v3776_v33 }
 0x7df   :  { %1382 = vmatpush1.msra.mxu0 %v3779_v35 }
 0x7e0   :  { %1383 = vmatprep.subr.mxu0 %v3782_v46 }
 0x7e1   :  { %1384 = vmatpush1.msra.mxu0 %v3785_v48 }
 0x7e2   :  { %2759 = vmatmul.mubr.msk.f32.vlgmr.msra.gmra.mxu0 %vm259_vm1, %v1179_v49  ;;  %1545 = vmatprep.subr.mxu0 %v3354_v53  ;;  %v3806_v53 = vld [vmem:[#allocation2 + $0x148] sm:$0xff] }
 0x7e3   :  { %1546 = vmatpush1.msra.mxu0 %v3360_v55  ;;  %1593 = vmatprep.mubr.f32.mxu0 %v4225_v38  ;;  %4248 = vst [vmem:[#allocation17_spill] sm:$0xff] %v3806_v53 }
 0x7e4   :  { %1547 = vmatprep.subr.mxu0 %v3366_v57 }
 0x7e5   :  { %1548 = vmatpush1.msra.mxu0 %v3372_v59 }
 0x7e6   :  { %1549 = vmatprep.subr.mxu0 %v3383_v62 }
 0x7e7   :  { %1550 = vmatpush1.msra.mxu0 %v3389_v5 }
 0x7e8   :  { %1551 = vmatprep.subr.mxu0 %v3395_v8 }
 0x7e9   :  { %1552 = vmatpush1.msra.mxu0 %v3406_v13 }
 0x7ea   :  { %1553 = vmatprep.subr.mxu0 %v4237_v2  ;;  %v4249_v2 = vld [vmem:[#allocation21_spill] sm:$0xff] }
 0x7eb   :  { %1554 = vmatpush1.msra.mxu0 %v4238_v3  ;;  %v237_v3 = vadd.f32 %v4249_v2, %v3321_v30  ;;  %v3835_v2 = vld [vmem:[#allocation2 + $0x130] sm:$0xff] }
 0x7ec   :  { %1555 = vmatprep.subr.mxu0 %v4239_v4 }
 0x7ed   :  { %1556 = vmatpush1.msra.mxu0 %v4240_v6 }
 0x7ee   :  { %1557 = vmatprep.subr.mxu0 %v4241_v9 }
 0x7ef   :  { %1558 = vmatpush1.msra.mxu0 %v4242_v11 }
 0x7f0   :  { %1559 = vmatprep.subr.mxu0 %v4243_v14 }
 0x7f1   :  { %1560 = vmatpush1.msra.mxu0 %v4244_v16 }
 0x7f2   :  { %1740 = vmatprep.subr.mxu0 %v3806_v53 }
 0x886   :  { %v1324_v59 = vpop.f32.mrf.mxu1 }
 0x888   :  { %v1326_v6 = vpop.f32.mrf.mxu1 }
 0x892   :  { %v1248_v55 = vpop.f32.mrf.mxu0 }
 0x893   :  { %v1249_v57 = vadd.f32 %v1248_v55, %v3556_v41 }
 0x894   :  { %v1250_v8 = vpop.f32.mrf.mxu0 }
 0x895   :  { %v1329_v62 = vadd.f32 %v1324_v59, %v1249_v57  ;;  %v1251_v13 = vadd.f32 %v1250_v8, %v3561_v0 }
 0x897   :  { %v2757_v5 = vmul.f32 -1.442695, %v1329_v62  ;;  %v1330_v11 = vadd.f32 %v1326_v6, %v1251_v13  ;;  %v3832_v13 = vld [vmem:[#allocation2 + $0x138] sm:$0xff] }
 0x898   :  { %v3844_v6 = vld [vmem:[#allocation2 + $0x118] sm:$0xff] }
 0x899   :  { %3016 = vpow2.f32 %v2757_v5  ;;  %v2758_v17 = vmul.f32 -1.442695, %v1330_v11 }
 0x8a2   :  { %v1419_v4 = vpop.f32.mrf.mxu0 }
 0x8a3   :  { %v1424_v9 = vadd.f32 %v1419_v4, %v237_v3  ;;  %v3838_v3 = vld [vmem:[#allocation2 + $0x128] sm:$0xff]  ;;  %v3841_v4 = vld [vmem:[#allocation2 + $0x120] sm:$0xff] }
 0x8a4   :  { %v1421_v47 = vpop.f32.mrf.mxu0 }
 0x8a5   :  { %v2760_v14 = vmul.f32 -1.442695, %v1424_v9  ;;  %v1425_v18 = vadd.f32 %v1421_v47, %v239_v27  ;;  %v3847_v9 = vld [vmem:[#allocation2 + $0x110] sm:$0xff]  ;;  %v3862_v47 = vld [vmem:[#allocation2 + $0xe8] sm:$0xff]  ;;  %v3865_v27 = vld [vmem:[#allocation2 + $0xe0] sm:$0xff] }
 0x8a6   :  { %v3017_v16 = vpop.eup %3016 }
 0x8a7   :  { %v1337_v29 = vadd.f32 1.0, %v3017_v16  ;;  %3018 = vpow2.f32 %v2760_v14  ;;  %v2761_v10 = vmul.f32 -1.442695, %v1425_v18  ;;  %v3853_v14 = vld [vmem:[#allocation2 + $0x100] sm:$0xff]  ;;  %v3856_v16 = vld [vmem:[#allocation2 + $0xf8] sm:$0xff] }
 0x8a8   :  { %3020 = vtanh.f32 %v1330_v11  ;;  %v3850_v11 = vld [vmem:[#allocation2 + $0x108] sm:$0xff] }
 0x8a9   :  { %3022 = vrcp.f32 %v1337_v29  ;;  %v3859_v29 = vld [vmem:[#allocation2 + $0xf0] sm:$0xff] }
 0x8aa   :  { %3024 = vtanh.f32 %v1425_v18  ;;  %v3869_v18 = vld [vmem:[#allocation2 + $0xd8] sm:$0xff] }
 0x8b4   :  { %v3019_v20 = vpop.eup %3018 }
 0x8b5   :  { %v3021_v1 = vpop.eup %3020  ;;  %v1432_v21 = vadd.f32 1.0, %v3019_v20  ;;  %v3875_v20 = vld [vmem:[#allocation2 + $0xd0] sm:$0xff] }
 0x8b6   :  { %v3023_v22 = vpop.eup %3022 }
 0x8b7   :  { %3026 = vrcp.f32 %v1432_v21  ;;  %v1345_v23 = vmul.f32 %v3023_v22, %v3021_v1  ;;  %v3025_v24 = vpop.eup %3024  ;;  %v1344_v40 = vmul.f32 %v3023_v22, %v3712_v42  ;;  %v3893_v1 = vld [vmem:[#allocation2 + $0x1c8] sm:$0xff]  ;;  %v3896_v21 = vld [vmem:[#allocation2 + $0x1c0] sm:$0xff]  ;;  %v3900_v22 = vld [vmem:[#allocation2 + $0x1b8] sm:$0xff] }
 0x8b8   :  { %3028 = vpow2.f32 %v2758_v17  ;;  %v3915_v17 = vld [vmem:[#allocation2 + $0x190] sm:$0xff] }
 0x8b9   :  { %1347 = vrot.lane.b32.xlu1 %v1345_v23, %s3231_s26  ;;  %3030 = vpow2.f32 %v2761_v10  ;;  %v3903_v23 = vld [vmem:[#allocation2 + $0x1b0] sm:$0xff]  ;;  %v3918_v10 = vld [vmem:[#allocation2 + $0x188] sm:$0xff] }
 0x8c4   :  { %v3027_v25 = vpop.eup %3026 }
 0x8c5   :  { %v1440_v43 = vmul.f32 %v3027_v25, %v3025_v24  ;;  %v3029_v26 = vpop.eup %3028  ;;  %v1439_v60 = vmul.f32 %v3027_v25, %v3716_v34  ;;  %v3828_v34 = vld [vmem:[#allocation2 + $0x140] sm:$0xff]  ;;  %v3906_v24 = vld [vmem:[#allocation2 + $0x1a8] sm:$0xff] }
 0x8c6   :  { %v1338_v28 = vadd.f32 1.0, %v3029_v26  ;;  %v3031_v39 = vpop.eup %3030  ;;  %v3909_v25 = vld [vmem:[#allocation2 + $0x1a0] sm:$0xff] }
 0x8c7   :  { %1442 = vrot.lane.b32.xlu0 %v1440_v43, %s3231_s26  ;;  %v1433_v32 = vadd.f32 1.0, %v3031_v39  ;;  %v3912_v43 = vld [vmem:[#allocation2 + $0x198] sm:$0xff]  ;;  %v3921_v26 = vld [vmem:[#allocation2 + $0x180] sm:$0xff] }
 0x8c8   :  { %3032 = vrcp.f32 %v1338_v28  ;;  %v3924_v28 = vld [vmem:[#allocation2 + $0x178] sm:$0xff]  ;;  %v3933_v39 = vld [vmem:[#allocation2 + $0x160] sm:$0xff] }
 0x8c9   :  { %4251 = vst [vmem:[#allocation18_spill] sm:$0xff] %v3924_v28  ;;  %4254 = vst [vmem:[#allocation11_spill] sm:$0xff] %v3933_v39 }
 0x8d5   :  { %v3033_v49 = vpop.eup %3032 }
 0x92b   :  { %v1348_v36 = vpop.permute.xlu1 %1347 }
 0x92c   :  { %v3818_v45 = vadd.f32 %v1348_v36, %v1344_v40  ;;  %v3927_v40 = vld [vmem:[#allocation2 + $0x170] sm:$0xff]  ;;  %v3930_v36 = vld [vmem:[#allocation2 + $0x168] sm:$0xff] }
 0x92d   :  { %4252 = vst [vmem:[#allocation9_spill] sm:$0xff] %v3927_v40  ;;  %4253 = vst [vmem:[#allocation10_spill] sm:$0xff] %v3930_v36 }
 0x92e   :  { %3034 = vtanh.f32 %v3818_v45 }
 0x92f   :  { %3036 = vrcp.f32 %v1433_v32  ;;  %v3936_v32 = vld [vmem:[#allocation2 + $0x158] sm:$0xff] }
 0x930   :  { %4255 = vst [vmem:[#allocation12_spill] sm:$0xff] %v3936_v32 }
 0x939   :  { %v1443_v51 = vpop.permute.xlu0 %1442 }
 0x93a   :  { %v3822_v55 = vadd.f32 %v1443_v51, %v1439_v60  ;;  %v3939_v60 = vld [vmem:[#allocation2 + $0x150] sm:$0xff] }
 0x93b   :  { %v3035_v57 = vpop.eup %3034  ;;  %4256 = vst [vmem:[#allocation13_spill] sm:$0xff] %v3939_v60 }
 0x93c   :  { %3038 = vtanh.f32 %v3822_v55  ;;  %v1352_v59 = vmul.f32 %v3035_v57, %v3033_v49  ;;  %v3037_v42 = vpop.eup %3036 }
 0x93e   :  { %1525 = vrot.lane.b32.xlu1 %v1352_v59, %s3231_s26 }
 0x949   :  { %v3039_v62 = vpop.eup %3038 }
 0x94a   :  { %v1447_v5 = vmul.f32 %v3039_v62, %v3037_v42 }
 0x94c   :  { %1449 = vrot.lane.b32.xlu0 %v1447_v5, %s3231_s26 }
 0x9b0   :  { %v1526_v8 = vpop.permute.xlu1 %1525 }
 0x9b1   :  { %2763 = vmatmul.mubr.msk.f32.vlgmr.msra.gmra.mxu0 %vm259_vm1, %v1526_v8  ;;  %v4257_v8 = vld [vmem:[#allocation23_spill] sm:$0xff] }
 0x9b2   :  { %1741 = vmatpush1.msra.mxu0 %v3828_v34  ;;  %1788 = vmatprep.mubr.f32.mxu0 %v4225_v38 }
 0x9b3   :  { %1742 = vmatprep.subr.mxu0 %v3832_v13 }
 0x9b4   :  { %1743 = vmatpush1.msra.mxu0 %v3835_v2 }
 0x9b5   :  { %1744 = vmatprep.subr.mxu0 %v3838_v3 }
 0x9b6   :  { %1745 = vmatpush1.msra.mxu0 %v3841_v4 }
 0x9b7   :  { %1746 = vmatprep.subr.mxu0 %v3844_v6 }
 0x9b8   :  { %1747 = vmatpush1.msra.mxu0 %v3847_v9 }
 0x9b9   :  { %1748 = vmatprep.subr.mxu0 %v3850_v11 }
 0x9ba   :  { %1749 = vmatpush1.msra.mxu0 %v3853_v14 }
 0x9bb   :  { %1750 = vmatprep.subr.mxu0 %v3856_v16 }
 0x9bc   :  { %1751 = vmatpush1.msra.mxu0 %v3859_v29 }
 0x9bd   :  { %1752 = vmatprep.subr.mxu0 %v3862_v47 }
 0x9be   :  { %v1450_v44 = vpop.permute.xlu0 %1449  ;;  %1753 = vmatpush1.msra.mxu0 %v3865_v27 }
 0x9bf   :  { %2762 = vmatmul.mubr.msk.f32.vlgmr.msra.gmra.mxu1 %vm259_vm1, %v1450_v44  ;;  %1754 = vmatprep.subr.mxu0 %v3869_v18 }
 0x9c0   :  { %1641 = vmatpush1.msra.mxu1 %v3736_v50  ;;  %1688 = vmatprep.mubr.f32.mxu1 %v4225_v38 }
 0x9c1   :  { %1642 = vmatprep.subr.mxu1 %v3740_v52  ;;  %1755 = vmatpush1.msra.mxu0 %v3875_v20 }
 0x9c2   :  { %1643 = vmatpush1.msra.mxu1 %v3744_v54  ;;  %1911 = vmatprep.subr.mxu0 %v3755_v61 }
 0x9c3   :  { %1644 = vmatprep.subr.mxu1 %v3748_v56 }
 0x9c4   :  { %1645 = vmatpush1.msra.mxu1 %v3752_v58 }
 0x9c5   :  { %1646 = vmatprep.subr.mxu1 %v3758_v63 }
 0x9c6   :  { %1647 = vmatpush1.msra.mxu1 %v3761_v7 }
 0x9c7   :  { %1648 = vmatprep.subr.mxu1 %v3764_v12 }
 0x9c8   :  { %1649 = vmatpush1.msra.mxu1 %v3767_v15 }
 0x9c9   :  { %1650 = vmatprep.subr.mxu1 %v3770_v19 }
 0x9ca   :  { %1651 = vmatpush1.msra.mxu1 %v3773_v31 }
 0x9cb   :  { %1652 = vmatprep.subr.mxu1 %v3776_v33 }
 0x9cc   :  { %1653 = vmatpush1.msra.mxu1 %v3779_v35 }
 0x9cd   :  { %1654 = vmatprep.subr.mxu1 %v3782_v46 }
 0x9ce   :  { %1655 = vmatpush1.msra.mxu1 %v3785_v48 }
 0x9cf   :  { %2766 = vmatmul.mubr.msk.f32.vlgmr.msra.gmra.mxu1 %vm259_vm1, %v1450_v44  ;;  %1816 = vmatprep.subr.mxu1 %v3893_v1  ;;  %v243_v44 = vadd.f32 %v4257_v8, %v3321_v30 }
 0x9d0   :  { %1817 = vmatpush1.msra.mxu1 %v3896_v21  ;;  %1864 = vmatprep.mubr.f32.mxu1 %v4225_v38 }
 0x9d1   :  { %1818 = vmatprep.subr.mxu1 %v3900_v22 }
 0x9d2   :  { %1819 = vmatpush1.msra.mxu1 %v3903_v23 }
 0x9d3   :  { %1820 = vmatprep.subr.mxu1 %v3906_v24 }
 0x9d4   :  { %1821 = vmatpush1.msra.mxu1 %v3909_v25 }
 0x9d5   :  { %1822 = vmatprep.subr.mxu1 %v3912_v43 }
 0x9d6   :  { %1823 = vmatpush1.msra.mxu1 %v3915_v17 }
 0x9d7   :  { %1824 = vmatprep.subr.mxu1 %v3918_v10 }
 0x9d8   :  { %1825 = vmatpush1.msra.mxu1 %v3921_v26 }
 0x9d9   :  { %1826 = vmatprep.subr.mxu1 %v3924_v28 }
 0x9da   :  { %1827 = vmatpush1.msra.mxu1 %v3927_v40 }
 0x9db   :  { %1828 = vmatprep.subr.mxu1 %v3930_v36 }
 0x9dc   :  { %1829 = vmatpush1.msra.mxu1 %v3933_v39 }
 0x9dd   :  { %1830 = vmatprep.subr.mxu1 %v3936_v32 }
 0x9de   :  { %1831 = vmatpush1.msra.mxu1 %v3939_v60 }
 0x9df   :  { %2011 = vmatprep.subr.mxu1 %v3806_v53 }
 0xa71   :  { %v1595_v57 = vpop.f32.mrf.mxu0 }
 0xa73   :  { %v1597_v39 = vpop.f32.mrf.mxu0 }
 0xa7f   :  { %v1519_v51 = vpop.f32.mrf.mxu1 }
 0xa80   :  { %v1520_v49 = vadd.f32 %v1519_v51, %v3556_v41 }
 0xa81   :  { %v1521_v62 = vpop.f32.mrf.mxu1 }
 0xa82   :  { %v1600_v59 = vadd.f32 %v1595_v57, %v1520_v49  ;;  %v1522_v5 = vadd.f32 %v1521_v62, %v3561_v0  ;;  %v4258_v49 = vld [vmem:[#allocation24_spill] sm:$0xff] }
 0xa83   :  { %v245_v57 = vadd.f32 %v4258_v49, %v3327_v37 }
 0xa84   :  { %v2764_v42 = vmul.f32 -1.442695, %v1600_v59  ;;  %v1601_v40 = vadd.f32 %v1597_v39, %v1522_v5 }
 0xa86   :  { %3040 = vpow2.f32 %v2764_v42 }
 0xa8f   :  { %v1690_v32 = vpop.f32.mrf.mxu1 }
 0xa90   :  { %v1695_v36 = vadd.f32 %v1690_v32, %v243_v44 }
 0xa91   :  { %v1692_v51 = vpop.f32.mrf.mxu1 }
 0xa92   :  { %v2767_v60 = vmul.f32 -1.442695, %v1695_v36  ;;  %v1696_v59 = vadd.f32 %v1692_v51, %v245_v57 }
 0xa93   :  { %v3041_v28 = vpop.eup %3040 }
 0xa94   :  { %v1608_v53 = vadd.f32 1.0, %v3041_v28  ;;  %3042 = vpow2.f32 %v2767_v60  ;;  %v2768_v32 = vmul.f32 -1.442695, %v1696_v59 }
 0xa95   :  { %3044 = vtanh.f32 %v1601_v40 }
 0xa96   :  { %3046 = vrcp.f32 %v1608_v53  ;;  %v2765_v53 = vmul.f32 -1.442695, %v1601_v40 }
 0xa97   :  { %3048 = vtanh.f32 %v1696_v59 }
 0xaa1   :  { %v3043_v42 = vpop.eup %3042 }
 0xaa2   :  { %v3045_v62 = vpop.eup %3044  ;;  %v1703_v0 = vadd.f32 1.0, %v3043_v42 }
 0xaa3   :  { %v3047_v41 = vpop.eup %3046 }
 0xaa4   :  { %3050 = vrcp.f32 %v1703_v0  ;;  %v1616_v8 = vmul.f32 %v3047_v41, %v3045_v62  ;;  %v3049_v36 = vpop.eup %3048  ;;  %v1615_v44 = vmul.f32 %v3047_v41, %v3818_v45 }
 0xaa5   :  { %3052 = vpow2.f32 %v2765_v53 }
 0xaa6   :  { %1618 = vrot.lane.b32.xlu1 %v1616_v8, %s3231_s26  ;;  %3054 = vpow2.f32 %v2768_v32  ;;  %v4261_v32 = vld [vmem:[#allocation10_spill] sm:$0xff] }
 0xab1   :  { %v3051_v39 = vpop.eup %3050 }
 0xab2   :  { %v1711_v28 = vmul.f32 %v3051_v39, %v3049_v36  ;;  %v3053_v60 = vpop.eup %3052  ;;  %v1710_v42 = vmul.f32 %v3051_v39, %v3822_v55  ;;  %v4260_v39 = vld [vmem:[#allocation9_spill] sm:$0xff] }
 0xab3   :  { %v1609_v5 = vadd.f32 1.0, %v3053_v60  ;;  %v3055_v0 = vpop.eup %3054  ;;  %v4262_v60 = vld [vmem:[#allocation11_spill] sm:$0xff] }
 0xab4   :  { %1713 = vrot.lane.b32.xlu0 %v1711_v28, %s3231_s26  ;;  %v1704_v57 = vadd.f32 1.0, %v3055_v0 }
 0xab5   :  { %3056 = vrcp.f32 %v1609_v5  ;;  %v4263_v5 = vld [vmem:[#allocation12_spill] sm:$0xff] }
 0xac2   :  { %v3057_v8 = vpop.eup %3056 }
 0xb18   :  { %v1619_v51 = vpop.permute.xlu1 %1618 }
 0xb19   :  { %v3952_v49 = vadd.f32 %v1619_v51, %v1615_v44  ;;  %v4264_v44 = vld [vmem:[#allocation13_spill] sm:$0xff] }
 0xb1a   :  { %v4265_v51 = vld [vmem:[#allocation17_spill] sm:$0xff] }
 0xb1b   :  { %3058 = vtanh.f32 %v3952_v49 }
 0xb1c   :  { %3060 = vrcp.f32 %v1704_v57  ;;  %v4266_v57 = vld [vmem:[#allocation29_spill] sm:$0xff] }
 0xb26   :  { %v1714_v62 = vpop.permute.xlu0 %1713 }
 0xb27   :  { %v3956_v40 = vadd.f32 %v1714_v62, %v1710_v42 }
 0xb28   :  { %v3059_v59 = vpop.eup %3058 }
 0xb29   :  { %3062 = vtanh.f32 %v3956_v40  ;;  %v1623_v36 = vmul.f32 %v3059_v59, %v3057_v8  ;;  %v3061_v41 = vpop.eup %3060 }
 0xb2b   :  { %1796 = vrot.lane.b32.xlu1 %v1623_v36, %s3231_s26 }
 0xb36   :  { %v3063_v45 = vpop.eup %3062 }
 0xb37   :  { %v1718_v28 = vmul.f32 %v3063_v45, %v3061_v41  ;;  %v4267_v41 = vld [vmem:[#allocation30_spill] sm:$0xff] }
 0xb39   :  { %1720 = vrot.lane.b32.xlu0 %v1718_v28, %s3231_s26  ;;  %v4268_v28 = vld [vmem:[#allocation25_spill] sm:$0xff] }
 0xb9d   :  { %v1797_v53 = vpop.permute.xlu1 %1796 }
 0xb9e   :  { %2770 = vmatmul.mubr.msk.f32.vlgmr.msra.gmra.mxu1 %vm259_vm1, %v1797_v53  ;;  %v249_v53 = vadd.f32 %v4268_v28, %v3321_v30 }
 0xb9f   :  { %2012 = vmatpush1.msra.mxu1 %v3828_v34  ;;  %2059 = vmatprep.mubr.f32.mxu1 %v4225_v38 }
 0xba0   :  { %2013 = vmatprep.subr.mxu1 %v3832_v13 }
 0xba1   :  { %2014 = vmatpush1.msra.mxu1 %v3835_v2 }
 0xba2   :  { %2015 = vmatprep.subr.mxu1 %v3838_v3 }
 0xba3   :  { %2016 = vmatpush1.msra.mxu1 %v3841_v4 }
 0xba4   :  { %2017 = vmatprep.subr.mxu1 %v3844_v6 }
 0xba5   :  { %2018 = vmatpush1.msra.mxu1 %v3847_v9 }
 0xba6   :  { %2019 = vmatprep.subr.mxu1 %v3850_v11 }
 0xba7   :  { %2020 = vmatpush1.msra.mxu1 %v3853_v14 }
 0xba8   :  { %2021 = vmatprep.subr.mxu1 %v3856_v16 }
 0xba9   :  { %2022 = vmatpush1.msra.mxu1 %v3859_v29 }
 0xbaa   :  { %2023 = vmatprep.subr.mxu1 %v3862_v47 }
 0xbab   :  { %v1721_v55 = vpop.permute.xlu0 %1720  ;;  %2024 = vmatpush1.msra.mxu1 %v3865_v27 }
 0xbac   :  { %2769 = vmatmul.mubr.msk.f32.vlgmr.msra.gmra.mxu0 %vm259_vm1, %v1721_v55  ;;  %2025 = vmatprep.subr.mxu1 %v3869_v18 }
 0xbad   :  { %1912 = vmatpush1.msra.mxu0 %v3736_v50  ;;  %1959 = vmatprep.mubr.f32.mxu0 %v4225_v38 }
 0xbae   :  { %1913 = vmatprep.subr.mxu0 %v3740_v52  ;;  %2026 = vmatpush1.msra.mxu1 %v3875_v20 }
 0xbaf   :  { %1914 = vmatpush1.msra.mxu0 %v3744_v54  ;;  %2182 = vmatprep.subr.mxu1 %v3755_v61  ;;  %v4259_v61 = vld [vmem:[#allocation18_spill] sm:$0xff] }
 0xbb0   :  { %1915 = vmatprep.subr.mxu0 %v3748_v56 }
 0xbb1   :  { %1916 = vmatpush1.msra.mxu0 %v3752_v58 }
 0xbb2   :  { %1917 = vmatprep.subr.mxu0 %v3758_v63 }
 0xbb3   :  { %1918 = vmatpush1.msra.mxu0 %v3761_v7 }
 0xbb4   :  { %1919 = vmatprep.subr.mxu0 %v3764_v12 }
 0xbb5   :  { %1920 = vmatpush1.msra.mxu0 %v3767_v15 }
 0xbb6   :  { %1921 = vmatprep.subr.mxu0 %v3770_v19 }
 0xbb7   :  { %1922 = vmatpush1.msra.mxu0 %v3773_v31 }
 0xbb8   :  { %1923 = vmatprep.subr.mxu0 %v3776_v33 }
 0xbb9   :  { %1924 = vmatpush1.msra.mxu0 %v3779_v35 }
 0xbba   :  { %1925 = vmatprep.subr.mxu0 %v3782_v46 }
 0xbbb   :  { %1926 = vmatpush1.msra.mxu0 %v3785_v48 }
 0xbbc   :  { %2773 = vmatmul.mubr.msk.f32.vlgmr.msra.gmra.mxu0 %vm259_vm1, %v1721_v55  ;;  %2087 = vmatprep.subr.mxu0 %v3893_v1 }
 0xbbd   :  { %2088 = vmatpush1.msra.mxu0 %v3896_v21  ;;  %2135 = vmatprep.mubr.f32.mxu0 %v4225_v38 }
 0xbbe   :  { %2089 = vmatprep.subr.mxu0 %v3900_v22 }
 0xbbf   :  { %2090 = vmatpush1.msra.mxu0 %v3903_v23 }
 0xbc0   :  { %2091 = vmatprep.subr.mxu0 %v3906_v24 }
 0xbc1   :  { %2092 = vmatpush1.msra.mxu0 %v3909_v25 }
 0xbc2   :  { %2093 = vmatprep.subr.mxu0 %v3912_v43 }
 0xbc3   :  { %2094 = vmatpush1.msra.mxu0 %v3915_v17 }
 0xbc4   :  { %2095 = vmatprep.subr.mxu0 %v3918_v10 }
 0xbc5   :  { %2096 = vmatpush1.msra.mxu0 %v3921_v26 }
 0xbc6   :  { %2097 = vmatprep.subr.mxu0 %v4259_v61 }
 0xbc7   :  { %2098 = vmatpush1.msra.mxu0 %v4260_v39 }
 0xbc8   :  { %2099 = vmatprep.subr.mxu0 %v4261_v32 }
 0xbc9   :  { %2100 = vmatpush1.msra.mxu0 %v4262_v60 }
 0xbca   :  { %2101 = vmatprep.subr.mxu0 %v4263_v5 }
 0xbcb   :  { %2102 = vmatpush1.msra.mxu0 %v4264_v44 }
 0xbcc   :  { %2282 = vmatprep.subr.mxu0 %v4265_v51 }
 0xc5e   :  { %v1866_v62 = vpop.f32.mrf.mxu1 }
 0xc60   :  { %v1868_v60 = vpop.f32.mrf.mxu1 }
 0xc6c   :  { %v1790_v0 = vpop.f32.mrf.mxu0 }
 0xc6d   :  { %v1791_v42 = vadd.f32 %v1790_v0, %v4266_v57 }
 0xc6e   :  { %v1792_v36 = vpop.f32.mrf.mxu0 }
 0xc6f   :  { %v1871_v8 = vadd.f32 %v1866_v62, %v1791_v42  ;;  %v1793_v45 = vadd.f32 %v1792_v36, %v4267_v41  ;;  %v4269_v42 = vld [vmem:[#allocation26_spill] sm:$0xff] }
 0xc70   :  { %v251_v62 = vadd.f32 %v4269_v42, %v3327_v37 }
 0xc71   :  { %v2771_v59 = vmul.f32 -1.442695, %v1871_v8  ;;  %v1872_v32 = vadd.f32 %v1868_v60, %v1793_v45 }
 0xc73   :  { %3064 = vpow2.f32 %v2771_v59 }
 0xc7c   :  { %v1961_v55 = vpop.f32.mrf.mxu0 }
 0xc7d   :  { %v1966_v5 = vadd.f32 %v1961_v55, %v249_v53 }
 0xc7e   :  { %v1963_v0 = vpop.f32.mrf.mxu0 }
 0xc7f   :  { %v2774_v44 = vmul.f32 -1.442695, %v1966_v5  ;;  %v1967_v8 = vadd.f32 %v1963_v0, %v251_v62 }
 0xc80   :  { %v3065_v39 = vpop.eup %3064 }
 0xc81   :  { %v1879_v51 = vadd.f32 1.0, %v3065_v39  ;;  %3066 = vpow2.f32 %v2774_v44  ;;  %v2772_v44 = vmul.f32 -1.442695, %v1872_v32  ;;  %v2775_v45 = vmul.f32 -1.442695, %v1967_v8 }
 0xc82   :  { %3068 = vtanh.f32 %v1872_v32 }
 0xc83   :  { %3070 = vrcp.f32 %v1879_v51 }
 0xc84   :  { %3072 = vtanh.f32 %v1967_v8 }
 0xc8e   :  { %v3067_v59 = vpop.eup %3066 }
 0xc8f   :  { %v3069_v36 = vpop.eup %3068  ;;  %v1974_v41 = vadd.f32 1.0, %v3067_v59 }
 0xc90   :  { %v3071_v57 = vpop.eup %3070 }
 0xc91   :  { %3074 = vrcp.f32 %v1974_v41  ;;  %v1887_v28 = vmul.f32 %v3071_v57, %v3069_v36  ;;  %v3073_v60 = vpop.eup %3072  ;;  %v1886_v51 = vmul.f32 %v3071_v57, %v3952_v49 }
 0xc92   :  { %3076 = vpow2.f32 %v2772_v44 }
 0xc93   :  { %1889 = vrot.lane.b32.xlu1 %v1887_v28, %s3231_s26  ;;  %3078 = vpow2.f32 %v2775_v45 }
 0xc9e   :  { %v3075_v5 = vpop.eup %3074 }
 0xc9f   :  { %v1982_v39 = vmul.f32 %v3075_v5, %v3073_v60  ;;  %v3077_v53 = vpop.eup %3076  ;;  %v1981_v59 = vmul.f32 %v3075_v5, %v3956_v40 }
 0xca0   :  { %v1880_v55 = vadd.f32 1.0, %v3077_v53  ;;  %v3079_v41 = vpop.eup %3078 }
 0xca1   :  { %1984 = vrot.lane.b32.xlu0 %v1982_v39, %s3231_s26  ;;  %v1975_v62 = vadd.f32 1.0, %v3079_v41 }
 0xca2   :  { %3080 = vrcp.f32 %v1880_v55 }
 0xcaf   :  { %v3081_v28 = vpop.eup %3080 }
 0xd05   :  { %v1890_v0 = vpop.permute.xlu1 %1889 }
 0xd06   :  { %v4024_v42 = vadd.f32 %v1890_v0, %v1886_v51 }
 0xd08   :  { %3082 = vtanh.f32 %v4024_v42 }
 0xd09   :  { %3084 = vrcp.f32 %v1975_v62 }
 0xd13   :  { %v1985_v36 = vpop.permute.xlu0 %1984 }
 0xd14   :  { %v4028_v32 = vadd.f32 %v1985_v36, %v1981_v59 }
 0xd15   :  { %v3083_v8 = vpop.eup %3082 }
 0xd16   :  { %3086 = vtanh.f32 %v4028_v32  ;;  %v1894_v60 = vmul.f32 %v3083_v8, %v3081_v28  ;;  %v3085_v49 = vpop.eup %3084 }
 0xd18   :  { %2067 = vrot.lane.b32.xlu1 %v1894_v60, %s3231_s26 }
 0xd23   :  { %v3087_v57 = vpop.eup %3086 }
 0xd24   :  { %v1989_v39 = vmul.f32 %v3087_v57, %v3085_v49 }
 0xd26   :  { %1991 = vrot.lane.b32.xlu0 %v1989_v39, %s3231_s26 }
 0xd8a   :  { %v2068_v44 = vpop.permute.xlu1 %2067 }
 0xd8b   :  { %2777 = vmatmul.mubr.msk.f32.vlgmr.msra.gmra.mxu0 %vm259_vm1, %v2068_v44 }
 0xd8c   :  { %2283 = vmatpush1.msra.mxu0 %v3828_v34  ;;  %2330 = vmatprep.mubr.f32.mxu0 %v4225_v38 }
 0xd8d   :  { %2284 = vmatprep.subr.mxu0 %v3832_v13 }
 0xd8e   :  { %2285 = vmatpush1.msra.mxu0 %v3835_v2 }
 0xd8f   :  { %2286 = vmatprep.subr.mxu0 %v3838_v3 }
 0xd90   :  { %2287 = vmatpush1.msra.mxu0 %v3841_v4 }
 0xd91   :  { %2288 = vmatprep.subr.mxu0 %v3844_v6 }
 0xd92   :  { %2289 = vmatpush1.msra.mxu0 %v3847_v9 }
 0xd93   :  { %2290 = vmatprep.subr.mxu0 %v3850_v11 }
 0xd94   :  { %2291 = vmatpush1.msra.mxu0 %v3853_v14 }
 0xd95   :  { %2292 = vmatprep.subr.mxu0 %v3856_v16 }
 0xd96   :  { %2293 = vmatpush1.msra.mxu0 %v3859_v29  ;;  %v4278_v29 = vld [vmem:[#allocation28_spill] sm:$0xff] }
 0xd97   :  { %2294 = vmatprep.subr.mxu0 %v3862_v47  ;;  %v257_v47 = vadd.f32 %v4278_v29, %v3327_v37  ;;  %v2457_v29 = vld [vmem:[#allocation4 + $0xa0] sm:$0xff] }
 0xd98   :  { %v1992_v34 = vpop.permute.xlu0 %1991  ;;  %2295 = vmatpush1.msra.mxu0 %v3865_v27 }
 0xd99   :  { %2776 = vmatmul.mubr.msk.f32.vlgmr.msra.gmra.mxu1 %vm259_vm1, %v1992_v34  ;;  %2296 = vmatprep.subr.mxu0 %v3869_v18 }
 0xd9a   :  { %2183 = vmatpush1.msra.mxu1 %v3736_v50  ;;  %2230 = vmatprep.mubr.f32.mxu1 %v4225_v38  ;;  %v4270_v50 = vld [vmem:[#allocation9_spill] sm:$0xff] }
 0xd9b   :  { %2184 = vmatprep.subr.mxu1 %v3740_v52  ;;  %2297 = vmatpush1.msra.mxu0 %v3875_v20  ;;  %v4271_v52 = vld [vmem:[#allocation10_spill] sm:$0xff] }
 0xd9c   :  { %2185 = vmatpush1.msra.mxu1 %v3744_v54  ;;  %2834 = vmatprep.subr.mxu0 %v4225_v38  ;;  %v4272_v54 = vld [vmem:[#allocation11_spill] sm:$0xff] }
 0xd9d   :  { %2186 = vmatprep.subr.mxu1 %v3748_v56  ;;  %v4273_v56 = vld [vmem:[#allocation12_spill] sm:$0xff] }
 0xd9e   :  { %2187 = vmatpush1.msra.mxu1 %v3752_v58  ;;  %v4274_v58 = vld [vmem:[#allocation13_spill] sm:$0xff] }
 0xd9f   :  { %2188 = vmatprep.subr.mxu1 %v3758_v63 }
 0xda0   :  { %2189 = vmatpush1.msra.mxu1 %v3761_v7  ;;  %v4275_v7 = vld [vmem:[#allocation29_spill] sm:$0xff] }
 0xda1   :  { %2190 = vmatprep.subr.mxu1 %v3764_v12 }
 0xda2   :  { %2191 = vmatpush1.msra.mxu1 %v3767_v15 }
 0xda3   :  { %2192 = vmatprep.subr.mxu1 %v3770_v19 }
 0xda4   :  { %2193 = vmatpush1.msra.mxu1 %v3773_v31 }
 0xda5   :  { %2194 = vmatprep.subr.mxu1 %v3776_v33 }
 0xda6   :  { %2195 = vmatpush1.msra.mxu1 %v3779_v35  ;;  %v4276_v35 = vld [vmem:[#allocation30_spill] sm:$0xff] }
 0xda7   :  { %2196 = vmatprep.subr.mxu1 %v3782_v46 }
 0xda8   :  { %2197 = vmatpush1.msra.mxu1 %v3785_v48  ;;  %v4277_v48 = vld [vmem:[#allocation27_spill] sm:$0xff] }
 0xda9   :  { %2780 = vmatmul.mubr.msk.f32.vlgmr.msra.gmra.mxu1 %vm259_vm1, %v1992_v34  ;;  %2358 = vmatprep.subr.mxu1 %v3893_v1  ;;  %v255_v13 = vadd.f32 %v4277_v48, %v3321_v30 }
 0xdaa   :  { %2359 = vmatpush1.msra.mxu1 %v3896_v21  ;;  %2406 = vmatprep.mubr.f32.mxu1 %v4225_v38 }
 0xdab   :  { %2360 = vmatprep.subr.mxu1 %v3900_v22 }
 0xdac   :  { %2361 = vmatpush1.msra.mxu1 %v3903_v23 }
 0xdad   :  { %2362 = vmatprep.subr.mxu1 %v3906_v24 }
 0xdae   :  { %2363 = vmatpush1.msra.mxu1 %v3909_v25 }
 0xdaf   :  { %2364 = vmatprep.subr.mxu1 %v3912_v43 }
 0xdb0   :  { %2365 = vmatpush1.msra.mxu1 %v3915_v17 }
 0xdb1   :  { %2366 = vmatprep.subr.mxu1 %v3918_v10 }
 0xdb2   :  { %2367 = vmatpush1.msra.mxu1 %v3921_v26 }
 0xdb3   :  { %2368 = vmatprep.subr.mxu1 %v4259_v61 }
 0xdb4   :  { %2369 = vmatpush1.msra.mxu1 %v4270_v50 }
 0xdb5   :  { %2370 = vmatprep.subr.mxu1 %v4271_v52 }
 0xdb6   :  { %2371 = vmatpush1.msra.mxu1 %v4272_v54 }
 0xdb7   :  { %2372 = vmatprep.subr.mxu1 %v4273_v56 }
 0xdb8   :  { %2373 = vmatpush1.msra.mxu1 %v4274_v58 }
 0xdb9   :  { %2853 = vmatprep.subr.mxu1 %v4225_v38 }
 0xe4b   :  { %v2137_v15 = vpop.f32.mrf.mxu0 }
 0xe4d   :  { %v2139_v3 = vpop.f32.mrf.mxu0 }
 0xe59   :  { %v2061_v63 = vpop.f32.mrf.mxu1 }
 0xe5a   :  { %v2062_v12 = vadd.f32 %v2061_v63, %v4275_v7 }
 0xe5b   :  { %v2063_v33 = vpop.f32.mrf.mxu1 }
 0xe5c   :  { %v2142_v19 = vadd.f32 %v2137_v15, %v2062_v12  ;;  %v2064_v46 = vadd.f32 %v2063_v33, %v4276_v35  ;;  %v2444_v12 = vld [vmem:[#allocation4 + $0x38] sm:$0xff]  ;;  %v2442_v15 = vld [vmem:[#allocation4 + $0x28] sm:$0xff]  ;;  %v2439_v33 = vld [vmem:[#allocation4 + $0x10] sm:$0xff] }
 0xe5e   :  { %v2778_v31 = vmul.f32 -1.442695, %v2142_v19  ;;  %v2143_v6 = vadd.f32 %v2139_v3, %v2064_v46  ;;  %v2441_v19 = vld [vmem:[#allocation4 + $0x20] sm:$0xff] }
 0xe5f   :  { %v2437_v46 = vld [vmem:[#allocation4] sm:$0xff] }
 0xe60   :  { %3088 = vpow2.f32 %v2778_v31  ;;  %v2779_v25 = vmul.f32 -1.442695, %v2143_v6  ;;  %v2440_v31 = vld [vmem:[#allocation4 + $0x18] sm:$0xff] }
 0xe69   :  { %v2232_v2 = vpop.f32.mrf.mxu1 }
 0xe6a   :  { %v2237_v4 = vadd.f32 %v2232_v2, %v255_v13 }
 0xe6b   :  { %v2234_v16 = vpop.f32.mrf.mxu1 }
 0xe6c   :  { %v2781_v9 = vmul.f32 -1.442695, %v2237_v4  ;;  %v2238_v27 = vadd.f32 %v2234_v16, %v257_v47  ;;  %v2458_v16 = vld [vmem:[#allocation4 + $0xa8] sm:$0xff]  ;;  %v2456_v47 = vld [vmem:[#allocation4 + $0x98] sm:$0xff] }
 0xe6d   :  { %v3089_v11 = vpop.eup %3088 }
 0xe6e   :  { %v2150_v14 = vadd.f32 1.0, %v3089_v11  ;;  %3090 = vpow2.f32 %v2781_v9  ;;  %v2782_v43 = vmul.f32 -1.442695, %v2238_v27  ;;  %v2461_v9 = vld [vmem:[#allocation4 + $0xc0] sm:$0xff]  ;;  %v2460_v11 = vld [vmem:[#allocation4 + $0xb8] sm:$0xff] }
 0xe6f   :  { %3092 = vtanh.f32 %v2143_v6 }
 0xe70   :  { %3094 = vrcp.f32 %v2150_v14  ;;  %v2459_v14 = vld [vmem:[#allocation4 + $0xb0] sm:$0xff] }
 0xe71   :  { %3096 = vtanh.f32 %v2238_v27 }
 0xe7b   :  { %v3091_v18 = vpop.eup %3090 }
 0xe7c   :  { %v3093_v20 = vpop.eup %3092  ;;  %v2245_v1 = vadd.f32 1.0, %v3091_v18 }
 0xe7d   :  { %v3095_v21 = vpop.eup %3094 }
 0xe7e   :  { %3098 = vrcp.f32 %v2245_v1  ;;  %v2158_v30 = vmul.f32 %v3095_v21, %v3093_v20  ;;  %v3097_v22 = vpop.eup %3096  ;;  %v2157_v10 = vmul.f32 %v3095_v21, %v4024_v42  ;;  %v2455_v20 = vld [vmem:[#allocation4 + $0x90] sm:$0xff] }
 0xe7f   :  { %3100 = vpow2.f32 %v2779_v25  ;;  %v2450_v25 = vld [vmem:[#allocation4 + $0x68] sm:$0xff] }
 0xe80   :  { %2160 = vrot.lane.b32.xlu1 %v2158_v30, %s3231_s26  ;;  %3102 = vpow2.f32 %v2782_v43  ;;  %v2454_v30 = vld [vmem:[#allocation4 + $0x88] sm:$0xff]  ;;  %v2449_v43 = vld [vmem:[#allocation4 + $0x60] sm:$0xff] }
 0xe8b   :  { %v3099_v23 = vpop.eup %3098 }
 0xe8c   :  { %v2253_v24 = vmul.f32 %v3099_v23, %v3097_v22  ;;  %v3101_v17 = vpop.eup %3100  ;;  %v2252_v45 = vmul.f32 %v3099_v23, %v4028_v32  ;;  %v2453_v22 = vld [vmem:[#allocation4 + $0x80] sm:$0xff]  ;;  %v2452_v23 = vld [vmem:[#allocation4 + $0x78] sm:$0xff] }
 0xe8d   :  { %v2151_v37 = vadd.f32 1.0, %v3101_v17  ;;  %v3103_v61 = vpop.eup %3102  ;;  %v2448_v17 = vld [vmem:[#allocation4 + $0x58] sm:$0xff] }
 0xe8e   :  { %2255 = vrot.lane.b32.xlu0 %v2253_v24, %s3231_s26  ;;  %v2246_v5 = vadd.f32 1.0, %v3103_v61  ;;  %v2451_v24 = vld [vmem:[#allocation4 + $0x70] sm:$0xff]  ;;  %v2476_v61 = vld [vmem:[#allocation4 + $0x138] sm:$0xff] }
 0xe8f   :  { %3104 = vrcp.f32 %v2151_v37  ;;  %v2447_v37 = vld [vmem:[#allocation4 + $0x50] sm:$0xff] }
 0xe9c   :  { %v3105_v55 = vpop.eup %3104 }
 0xef2   :  { %v2161_v26 = vpop.permute.xlu1 %2160 }
 0xef3   :  { %v4096_v40 = vadd.f32 %v2161_v26, %v2157_v10  ;;  %v2446_v10 = vld [vmem:[#allocation4 + $0x48] sm:$0xff] }
 0xef4   :  { %v2478_v26 = vld [vmem:[#allocation4 + $0x148] sm:$0xff] }
 0xef5   :  { %3106 = vtanh.f32 %v4096_v40 }
 0xef6   :  { %3108 = vrcp.f32 %v2246_v5  ;;  %v2475_v5 = vld [vmem:[#allocation4 + $0x130] sm:$0xff] }
 0xf00   :  { %v2256_v53 = vpop.permute.xlu0 %2255 }
 0xf01   :  { %v2258_v51 = vadd.f32 %v2256_v53, %v2252_v45  ;;  %v2474_v45 = vld [vmem:[#allocation4 + $0x128] sm:$0xff]  ;;  %v2473_v53 = vld [vmem:[#allocation4 + $0x120] sm:$0xff] }
 0xf02   :  { %v3107_v0 = vpop.eup %3106 }
 0xf03   :  { %3110 = vtanh.f32 %v2258_v51  ;;  %v2165_v41 = vmul.f32 %v3107_v0, %v3105_v55  ;;  %v3109_v42 = vpop.eup %3108  ;;  %v2472_v55 = vld [vmem:[#allocation4 + $0x118] sm:$0xff]  ;;  %v2787_v51 = vld [vmem:[#allocation4 + $0x40] ss:$0 sm:$0xff] }
 0xf05   :  { %2338 = vrot.lane.b32.xlu1 %v2165_v41, %s3231_s26 }
 0xf10   :  { %v3111_v62 = vpop.eup %3110 }
 0xf11   :  { %v2260_v59 = vmul.f32 %v3111_v62, %v3109_v42 }
 0xf13   :  { %2262 = vrot.lane.b32.xlu0 %v2260_v59, %s3231_s26  ;;  %v2471_v59 = vld [vmem:[#allocation4 + $0x110] sm:$0xff] }
 0xf77   :  { %v2339_v36 = vpop.permute.xlu1 %2338 }
 0xf78   :  { %2784 = vmatmul.mubr.msk.f32.vlgmr.msra.gmra.mxu1 %vm259_vm1, %v2339_v36  ;;  %v2470_v36 = vld [vmem:[#allocation4 + $0x108] sm:$0xff] }
 0xf79   :  { %2885 = vmatprep.mubr.msk.f32.mxu1 %vm3232_vm2, %v4225_v38  ;;  %2854 = vmatpush3.msra.mxu1 %v2461_v9 }
 0xf7a   :  { %2855 = vmatprep.subr.mxu1 %v4225_v38 }
 0xf7b   :  { %2856 = vmatpush3.msra.mxu1 %v2460_v11 }
 0xf7c   :  { %2857 = vmatprep.subr.mxu1 %v4225_v38 }
 0xf7d   :  { %2858 = vmatpush3.msra.mxu1 %v2459_v14 }
 0xf7e   :  { %2859 = vmatprep.subr.mxu1 %v4225_v38 }
 0xf7f   :  { %2860 = vmatpush3.msra.mxu1 %v2458_v16 }
 0xf80   :  { %2861 = vmatprep.subr.mxu1 %v4225_v38 }
 0xf81   :  { %2862 = vmatpush3.msra.mxu1 %v2457_v29 }
 0xf82   :  { %2863 = vmatprep.subr.mxu1 %v4225_v38 }
 0xf83   :  { %2864 = vmatpush3.msra.mxu1 %v2456_v47 }
 0xf84   :  { %2865 = vmatprep.subr.mxu1 %v4225_v38 }
 0xf85   :  { %v2263_v28 = vpop.permute.xlu0 %2262  ;;  %2866 = vmatpush3.msra.mxu1 %v2455_v20 }
 0xf86   :  { %2783 = vmatmul.mubr.msk.f32.vlgmr.msra.gmra.mxu0 %vm259_vm1, %v2263_v28  ;;  %2867 = vmatprep.subr.mxu1 %v4225_v38  ;;  %v2469_v28 = vld [vmem:[#allocation4 + $0x100] sm:$0xff] }
 0xf87   :  { %2835 = vmatpush3.msra.mxu0 %v2444_v12  ;;  %2850 = vmatprep.mubr.msk.f32.mxu0 %vm3232_vm2, %v4225_v38 }
 0xf88   :  { %2836 = vmatprep.subr.mxu0 %v4225_v38  ;;  %2868 = vmatpush3.msra.mxu1 %v2454_v30 }
 0xf89   :  { %2869 = vmatprep.subr.mxu1 %v4225_v38 }
 0xf8a   :  { %2870 = vmatpush3.msra.mxu1 %v2453_v22 }
 0xf8b   :  { %2871 = vmatprep.subr.mxu1 %v4225_v38 }
 0xf8c   :  { %2872 = vmatpush3.msra.mxu1 %v2452_v23 }
 0xf8d   :  { %2873 = vmatprep.subr.mxu1 %v4225_v38 }
 0xf8e   :  { %2874 = vmatpush3.msra.mxu1 %v2451_v24 }
 0xf8f   :  { %2875 = vmatprep.subr.mxu1 %v4225_v38 }
 0xf90   :  { %2876 = vmatpush3.msra.mxu1 %v2450_v25 }
 0xf91   :  { %2877 = vmatprep.subr.mxu1 %v4225_v38 }
 0xf92   :  { %2878 = vmatpush3.msra.mxu1 %v2449_v43 }
 0xf93   :  { %2879 = vmatprep.subr.mxu1 %v4225_v38 }
 0xf94   :  { %2880 = vmatpush3.msra.mxu1 %v2448_v17 }
 0xf95   :  { %2881 = vmatprep.subr.mxu1 %v4225_v38 }
 0xf96   :  { %2882 = vmatpush3.msra.mxu1 %v2447_v37 }
 0xf97   :  { %2883 = vmatprep.subr.mxu1 %v4225_v38 }
 0xf98   :  { %2884 = vmatpush3.msra.mxu1 %v2446_v10 }
0x1038   :  { %v2408_v60 = vpop.f32.mrf.mxu1 }
0x103a   :  { %v2410_v34 = vpop.f32.mrf.mxu1 }
0x1046   :  { %v2332_v32 = vpop.f32.mrf.mxu0 }
0x1047   :  { %v2333_v8 = vadd.f32 %v2332_v32, %v4275_v7  ;;  %v2443_v7 = vld [vmem:[#allocation4 + $0x30] sm:$0xff]  ;;  %v2468_v32 = vld [vmem:[#allocation4 + $0xf8] sm:$0xff] }
0x1048   :  { %v2334_v39 = vpop.f32.mrf.mxu0  ;;  %2837 = vmatpush3.msra.mxu0 %v2443_v7 }
0x1049   :  { %v2413_v49 = vadd.f32 %v2408_v60, %v2333_v8  ;;  %v2335_v44 = vadd.f32 %v2334_v39, %v4276_v35  ;;  %2838 = vmatprep.subr.mxu0 %v4225_v38  ;;  %v2438_v35 = vld [vmem:[#allocation4 + $0x8] sm:$0xff]  ;;  %v2467_v8 = vld [vmem:[#allocation4 + $0xf0] sm:$0xff] }
0x104a   :  { %2839 = vmatpush3.msra.mxu0 %v2442_v15  ;;  %v2466_v60 = vld [vmem:[#allocation4 + $0xe8] sm:$0xff]  ;;  %v2463_v39 = vld [vmem:[#allocation4 + $0xd0] sm:$0xff] }
0x104b   :  { %v2785_v57 = vmul.f32 -1.442695, %v2413_v49  ;;  %v2414_v50 = vadd.f32 %v2410_v34, %v2335_v44  ;;  %2840 = vmatprep.subr.mxu0 %v4225_v38  ;;  %v2465_v49 = vld [vmem:[#allocation4 + $0xe0] sm:$0xff]  ;;  %v2789_v44 = vld [vmem:[#allocation4 + $0xc8] ss:$0 sm:$0xff] }
0x104c   :  { %2841 = vmatpush3.msra.mxu0 %v2441_v19 }
0x104d   :  { %3112 = vpow2.f32 %v2785_v57  ;;  %2842 = vmatprep.subr.mxu0 %v4225_v38  ;;  %v2786_v48 = vmul.f32 -1.442695, %v2414_v50  ;;  %v2464_v57 = vld [vmem:[#allocation4 + $0xd8] sm:$0xff] }
0x104e   :  { %3114 = vtanh.f32 %v2414_v50  ;;  %2843 = vmatpush3.msra.mxu0 %v2440_v31 }
0x104f   :  { %2844 = vmatprep.subr.mxu0 %v4225_v38 }
0x1050   :  { %2845 = vmatpush3.msra.mxu0 %v2439_v33 }
0x1051   :  { %2846 = vmatprep.subr.mxu0 %v4225_v38 }
0x1052   :  { %2847 = vmatpush3.msra.mxu0 %v2438_v35 }
0x1053   :  { %2848 = vmatprep.subr.mxu0 %v4225_v38 }
0x1054   :  { %2849 = vmatpush3.msra.mxu0 %v2437_v46 }
0x1055   :  { %2888 = vmatprep.subr.mxu0 %v4225_v38 }
0x105a   :  { %v3113_v52 = vpop.eup %3112 }
0x105b   :  { %v2421_v54 = vadd.f32 1.0, %v3113_v52  ;;  %v3115_v56 = vpop.eup %3114 }
0x105d   :  { %3116 = vrcp.f32 %v2421_v54 }
0x105e   :  { %3118 = vpow2.f32 %v2786_v48 }
0x106a   :  { %v3117_v58 = vpop.eup %3116 }
0x106b   :  { %v2429_v63 = vmul.f32 %v3117_v58, %v3115_v56  ;;  %v3119_v13 = vpop.eup %3118  ;;  %v2428_v3 = vmul.f32 %v3117_v58, %v4096_v40  ;;  %v2477_v40 = vld [vmem:[#allocation4 + $0x140] sm:$0xff]  ;;  %v2790_v56 = vld [vmem:[#allocation4 + $0x150] ss:$0 sm:$0xff] }
0x106c   :  { %v2422_v2 = vadd.f32 1.0, %v3119_v13 }
0x106d   :  { %2431 = vrot.lane.b32.xlu0 %v2429_v63, %s3231_s26 }
0x106e   :  { %3120 = vrcp.f32 %v2422_v2 }
0x107b   :  { %v3121_v27 = vpop.eup %3120 }
0x10df   :  { %v2432_v4 = vpop.permute.xlu0 %2431 }
0x10e0   :  { %v2434_v6 = vadd.f32 %v2432_v4, %v2428_v3 }
0x10e2   :  { %3122 = vtanh.f32 %v2434_v6 }
0x10ef   :  { %v3123_v18 = vpop.eup %3122 }
0x10f0   :  { %v2436_v1 = vmul.f32 %v3123_v18, %v3121_v27 }
0x10f2   :  { %2485 = vrot.lane.b32.xlu1 %v2436_v1, %s3231_s26 }
0x1164   :  { %v2486_v21 = vpop.permute.xlu1 %2485 }
0x1165   :  { %2851 = vmatmul.mubr.msk.f32.vlgmr.msra.gmra.mxu0 %vm259_vm1, %v2486_v21 }
0x1166   :  { %2920 = vmatprep.mubr.msk.f32.mxu0 %vm3232_vm2, %v4225_v38  ;;  %2889 = vmatpush3.msra.mxu0 %v2478_v26 }
0x1167   :  { %2890 = vmatprep.subr.mxu0 %v4225_v38 }
0x1168   :  { %2891 = vmatpush3.msra.mxu0 %v2477_v40 }
0x1169   :  { %2892 = vmatprep.subr.mxu0 %v4225_v38 }
0x116a   :  { %2893 = vmatpush3.msra.mxu0 %v2476_v61 }
0x116b   :  { %2894 = vmatprep.subr.mxu0 %v4225_v38 }
0x116c   :  { %2895 = vmatpush3.msra.mxu0 %v2475_v5 }
0x116d   :  { %2896 = vmatprep.subr.mxu0 %v4225_v38 }
0x116e   :  { %2897 = vmatpush3.msra.mxu0 %v2474_v45 }
0x116f   :  { %2898 = vmatprep.subr.mxu0 %v4225_v38 }
0x1170   :  { %2899 = vmatpush3.msra.mxu0 %v2473_v53 }
0x1171   :  { %2900 = vmatprep.subr.mxu0 %v4225_v38 }
0x1172   :  { %2901 = vmatpush3.msra.mxu0 %v2472_v55 }
0x1173   :  { %2902 = vmatprep.subr.mxu0 %v4225_v38 }
0x1174   :  { %2903 = vmatpush3.msra.mxu0 %v2471_v59 }
0x1175   :  { %2904 = vmatprep.subr.mxu0 %v4225_v38 }
0x1176   :  { %2905 = vmatpush3.msra.mxu0 %v2470_v36 }
0x1177   :  { %2906 = vmatprep.subr.mxu0 %v4225_v38 }
0x1178   :  { %2907 = vmatpush3.msra.mxu0 %v2469_v28 }
0x1179   :  { %2908 = vmatprep.subr.mxu0 %v4225_v38 }
0x117a   :  { %2909 = vmatpush3.msra.mxu0 %v2468_v32 }
0x117b   :  { %2910 = vmatprep.subr.mxu0 %v4225_v38 }
0x117c   :  { %2911 = vmatpush3.msra.mxu0 %v2467_v8 }
0x117d   :  { %2912 = vmatprep.subr.mxu0 %v4225_v38 }
0x117e   :  { %2913 = vmatpush3.msra.mxu0 %v2466_v60 }
0x117f   :  { %2914 = vmatprep.subr.mxu0 %v4225_v38 }
0x1180   :  { %2915 = vmatpush3.msra.mxu0 %v2465_v49 }
0x1181   :  { %2916 = vmatprep.subr.mxu0 %v4225_v38 }
0x1182   :  { %2917 = vmatpush3.msra.mxu0 %v2464_v57 }
0x1183   :  { %2918 = vmatprep.subr.mxu0 %v4225_v38 }
0x1184   :  { %2919 = vmatpush3.msra.mxu0 %v2463_v39 }
0x1225   :  { %v2555_v0 = vpop.f32.mrf.mxu0 }
0x1226   :  { %v2556_v41 = vadd.f32 %v2787_v51, %v2555_v0 }
0x1227   :  { %v2852_v42 = vpop.f32.mrf.mxu0 }
0x1228   :  { %3124 = vtanh.f32 %v2556_v41 }
0x1235   :  { %v3125_v62 = vpop.eup %3124 }
0x1236   :  { %2886 = vmatmul.mubr.f32.vlgmr.msra.gmra.mxu1 %v3125_v62 }
0x12f6   :  { %v2630_v34 = vpop.f32.mrf.mxu1 }
0x12f7   :  { %v2631_v50 = vadd.f32 %v2789_v44, %v2630_v34 }
0x12f8   :  { %v2887_v52 = vpop.f32.mrf.mxu1 }
0x12f9   :  { %3126 = vtanh.f32 %v2631_v50 }
0x1306   :  { %v3127_v54 = vpop.eup %3126 }
0x1307   :  { %2921 = vmatmul.mubr.f32.vlgmr.msra.gmra.mxu0 %v3127_v54 }
0x13c7   :  { %v2705_v58 = vpop.f32.mrf.mxu0 }
0x13c8   :  { %v2706_v63 = vadd.f32 %v2790_v56, %v2705_v58 }
0x13c9   :  { %v2922_v12 = vpop.f32.mrf.mxu0 }
0x13ca   :  { %2709 = vmax.xlane.f32.xlu0 %v2706_v63 }
0x1453   :  { %v2710_v7 = vpop.xlane.xlu0 %2709 }
0x1454   :  { %v2711_v15 = vsub.f32 %v2706_v63, %v2710_v7 }
0x1456   :  { %v2712_v19 = vmul.f32 1.442695, %v2711_v15 }
0x1458   :  { %3128 = vpow2.f32 %v2712_v19 }
0x1465   :  { %v3129_v31 = vpop.eup %3128 }
0x1466   :  { %2714 = vadd.xlane.f32.xlu1 %v3129_v31 }
0x14ef   :  { %v2715_v38 = vpop.xlane.xlu1 %2714 }
0x14f0   :  { %3130 = vrcp.f32 %v2715_v38 }
0x14fd   :  { %v3131_v33 = vpop.eup %3130 }
0x14fe   :  { %v2717_v35 = vmul.f32 %v3131_v33, %v3129_v31 }
0x1500   :  { %2718 = vst [vmem:[%s4160_s3] sm:$0xff] %v2717_v35 }
0x1501   :  { %2723 = vsyncpa [#allocation3], 1 }
0x1502   :  { %2724 = vsyncpa [#allocation5], 1 }

</bundles_post_ra>
